<compile_context>
chip_gen: v6e
topology: v6e:2x2x1
jax: 0.10.0
libtpu: 0.0.40
codegen_flags: <defaults>
</compile_context>

<pallas_src>
import math

import jax
import jax.numpy as jnp
from jax import lax
from jax.experimental import pallas as pl
from jax.experimental.pallas import tpu as pltpu  # noqa: F401  (TPU backend)

# ------------------------- config (small, synthetic) -------------------------
B       = 2    # batch
S       = 8    # sequence length
D_HIDN  = 32   # model hidden dim
N_HEAD  = 4
D_HEAD  = 8    # per-head dim (N_HEAD * D_HEAD == 32)
PROJ_DROP = 0.1  # dropout prob (identity at inference)


# ------------------------------ fused kernel ---------------------------------
def _fused_mha_kernel(q_ref, k_ref, v_ref, m_ref,
                      wq_ref, bq_ref, wk_ref, bk_ref, wv_ref, bv_ref,
                      wo_ref, bo_ref,
                      out_ref, prob_ref):
    """Single-invocation fused MHA forward.

    q/k/v_ref : [B*S, D_HIDN] f32       m_ref  : [B, S, S] int32 (1 = masked)
    wq/wk/wv  : [D_HIDN, H*Dh] bf16     bq/bk/bv: [1, H*Dh] f32
    wo_ref    : [H, Dh, D_HIDN] bf16    bo_ref : [1, D_HIDN] f32
    out_ref   : [B*S, D_HIDN] f32       prob_ref: [B, H*S*S] f32 (lane-dense,
                                          row-major compatible with (B,H,S,S))
    Note: 1/sqrt(d_head) is already folded into wq/bq by the wrapper.
    """
    f32 = jnp.float32
    bf16 = jnp.bfloat16

    # bf16 activations into the MXU, f32 accumulation out of it.
    q_in = q_ref[...].astype(bf16)
    k_in = k_ref[...].astype(bf16)
    v_in = v_ref[...].astype(bf16)

    qp = jnp.dot(q_in, wq_ref[...], preferred_element_type=f32) + bq_ref[...]
    kp = jnp.dot(k_in, wk_ref[...], preferred_element_type=f32) + bk_ref[...]
    vp = jnp.dot(v_in, wv_ref[...], preferred_element_type=f32) + bv_ref[...]
    vp_b = vp.astype(bf16)                       # cast once, reused by all heads

    # Mask work hoisted out of the unrolled head loop: additive bias, computed once.
    bias = jnp.where(m_ref[...] > 0, f32(-1e9), f32(0.0))      # [B, S, S]

    out_acc = jnp.zeros((B * S, D_HIDN), f32)
    probs = []                                   # per-head, stored ONCE after the loop

    # Static (unrolled) loop over heads; everything stays in vregs/VMEM.
    for h in range(N_HEAD):
        cols = slice(h * D_HEAD, (h + 1) * D_HEAD)
        q_h = qp[:, cols].reshape(B, S, D_HEAD)
        k_h = kp[:, cols].reshape(B, S, D_HEAD)
        v_h = vp_b[:, cols].reshape(B, S, D_HEAD)

        # scores = q . k^T, contracting last axes directly (no XLU transpose of k)
        scores = lax.dot_general(
            q_h, k_h,
            dimension_numbers=(((2,), (2,)), ((0,), (0,))),
            preferred_element_type=f32)          # [B, S, S]
        scores = scores + bias

        # numerically stable softmax over the key axis (all f32; v5e-safe)
        scores = scores - jnp.max(scores, axis=-1, keepdims=True)
        p = jnp.exp(scores)
        p = p * pl.reciprocal(jnp.sum(p, axis=-1, keepdims=True), approx=True)

        ctx_h = lax.dot_general(
            p.astype(bf16), v_h,
            dimension_numbers=(((2,), (1,)), ((0,), (0,))),
            preferred_element_type=f32)          # [B, S, Dh]

        # proj(concat_h ctx_h) == sum_h ctx_h @ Wo[h*Dh:(h+1)*Dh]
        # -> accumulate the output projection per head; no merge-heads
        #    transpose/concat is ever materialized.
        out_acc = out_acc + jnp.dot(
            ctx_h.reshape(B * S, D_HEAD).astype(bf16), wo_ref[h],
            preferred_element_type=f32)

        probs.append(p.reshape(B, S * S))        # (b, h-block) row-major piece

    out_ref[...] = (out_acc + bo_ref[...]).astype(out_ref.dtype)
    # Single lane-dense store: columns [h*S*S : (h+1)*S*S] hold head h in
    # row-major (S, S) order, i.e. exactly the row-major layout of (B, H, S, S).
    prob_ref[...] = jnp.concatenate(probs, axis=-1).astype(prob_ref.dtype)


# ------------------------------ module wrapper --------------------------------
def init_params(key):
    """Deterministic init mimicking nn.Linear (uniform +-1/sqrt(fan_in))."""
    def linear_init(k, fan_in, fan_out):
        kw, kb = jax.random.split(k)
        bound = 1.0 / jnp.sqrt(jnp.float32(fan_in))
        w = jax.random.uniform(kw, (fan_in, fan_out), jnp.float32, -bound, bound)
        b = jax.random.uniform(kb, (fan_out,), jnp.float32, -bound, bound)
        return w, b

    k1, k2, k3, k4 = jax.random.split(key, 4)
    wq, bq = linear_init(k1, D_HIDN, N_HEAD * D_HEAD)
    wk, bk = linear_init(k2, D_HIDN, N_HEAD * D_HEAD)
    wv, bv = linear_init(k3, D_HIDN, N_HEAD * D_HEAD)
    wo, bo = linear_init(k4, N_HEAD * D_HEAD, D_HIDN)
    return dict(wq=wq, bq=bq, wk=wk, bk=bk, wv=wv, bv=bv, wo=wo, bo=bo)


def prepare_params(params):
    """One-time (init-time) parameter prep: fold the 1/sqrt(d_head) scale into
    Wq/bq, pre-cast matmul weights to bf16, pre-shape biases / Wo.  This runs
    once outside the forward, so it costs nothing per call."""
    scale = jnp.float32(1.0 / math.sqrt(D_HEAD))
    return dict(
        wq=(params["wq"] * scale).astype(jnp.bfloat16),
        bq=(params["bq"] * scale).reshape(1, -1).astype(jnp.float32),
        wk=params["wk"].astype(jnp.bfloat16),
        bk=params["bk"].reshape(1, -1).astype(jnp.float32),
        wv=params["wv"].astype(jnp.bfloat16),
        bv=params["bv"].reshape(1, -1).astype(jnp.float32),
        wo=params["wo"].reshape(N_HEAD, D_HEAD, D_HIDN).astype(jnp.bfloat16),
        bo=params["bo"].reshape(1, -1).astype(jnp.float32),
    )


def multi_head_attention(prepared, q, k, v, attn_mask):
    """Forward pass matching MultiHeadAttention.forward.

    q, k, v:   [B, S, D_HIDN] float32
    attn_mask: [B, S, S] int32 (1 = masked position, shared across heads)
    returns (output [B, S, D_HIDN], attn_prob [B, N_HEAD, S, S])
    """
    B_, S_, _ = q.shape
    assert (B_, S_) == (B, S)

    out2d, prob_flat = pl.pallas_call(
        _fused_mha_kernel,
        out_shape=(
            jax.ShapeDtypeStruct((B * S, D_HIDN), q.dtype),
            jax.ShapeDtypeStruct((B, N_HEAD * S * S), jnp.float32),
        ),
    )(
        q.reshape(B * S, D_HIDN),
        k.reshape(B * S, D_HIDN),
        v.reshape(B * S, D_HIDN),
        attn_mask,
        prepared["wq"], prepared["bq"],
        prepared["wk"], prepared["bk"],
        prepared["wv"], prepared["bv"],
        prepared["wo"], prepared["bo"],
    )

    out = out2d.reshape(B, S, D_HIDN)
    # Row-major-compatible reshape -> no copy, no transpose kernel.
    attn_prob = prob_flat.reshape(B, N_HEAD, S, S)
    # TODO(synk): proj_drop (nn.Dropout) is identity at inference; training-mode
    # dropout would use pltpu.prng_seed/prng_random_bits, omitted here.
    return out, attn_prob


# ----------------------------- pure-JAX reference ------------------------------
def reference_forward(params, q, k, v, attn_mask):
    B_, S_, _ = q.shape

    def proj(x, w, b):
        return (x @ w + b).reshape(B_, S_, N_HEAD, D_HEAD).transpose(0, 2, 1, 3)

    qh = proj(q, params["wq"], params["bq"])
    kh = proj(k, params["wk"], params["bk"])
    vh = proj(v, params["wv"], params["bv"])
    scores = jnp.einsum("bhqd,bhkd->bhqk", qh, kh) / jnp.sqrt(jnp.float32(D_HEAD))
    scores = jnp.where(attn_mask[:, None, :, :] > 0, jnp.float32(-1e9), scores)
    prob = jax.nn.softmax(scores, axis=-1)
    ctx = jnp.einsum("bhqk,bhkd->bhqd", prob, vh)
    ctx = ctx.transpose(0, 2, 1, 3).reshape(B_, S_, N_HEAD * D_HEAD)
    out = ctx @ params["wo"] + params["bo"]
    return out, prob


# ----------------------------------- main --------------------------------------
if __name__ == "__main__":
    key = jax.random.PRNGKey(0)
    kq, kk, kv, kp = jax.random.split(key, 4)

    q = jax.random.normal(kq, (B, S, D_HIDN), jnp.float32)
    k = jax.random.normal(kk, (B, S, D_HIDN), jnp.float32)
    v = jax.random.normal(kv, (B, S, D_HIDN), jnp.float32)

    # key-padding mask: batch 0 fully valid, batch 1 has last 3 keys masked.
    valid_len = jnp.array([S, S - 3], dtype=jnp.int32)
    key_pos = jnp.arange(S)[None, :]                          # [1, S]
    pad = (key_pos >= valid_len[:, None]).astype(jnp.int32)   # [B, S]
    attn_mask = jnp.broadcast_to(pad[:, None, :], (B, S, S)).astype(jnp.int32)

    params = init_params(kp)
    prepared = prepare_params(params)   # scale-folded, bf16 weights (one-time)

    fwd = jax.jit(multi_head_attention)
    out, attn_prob = fwd(prepared, q, k, v, attn_mask)
    jax.block_until_ready((out, attn_prob))

    assert out.shape == (B, S, D_HIDN)
    assert attn_prob.shape == (B, N_HEAD, S, S)

    # correctness vs. pure-f32 JAX reference
    # (loose tol: bf16 MXU inputs ~4e-3 rel + approx reciprocal ~1e-3 rel)
    ref_out, ref_prob = reference_forward(params, q, k, v, attn_mask)
    assert jnp.allclose(out, ref_out, atol=2e-2, rtol=2e-2), \
        float(jnp.max(jnp.abs(out - ref_out)))
    assert jnp.allclose(attn_prob, ref_prob, atol=2e-2, rtol=2e-2), \
        float(jnp.max(jnp.abs(attn_prob - ref_prob)))

    print("KERNEL_OK")
</pallas_src>

<mosaic_0001>
module attributes {stable_mosaic.version = 11 : i64} {
  func.func @_fused_mha_kernel(%arg0: memref<16x32xf32, #tpu.memory_space<vmem>>, %arg1: memref<16x32xf32, #tpu.memory_space<vmem>>, %arg2: memref<16x32xf32, #tpu.memory_space<vmem>>, %arg3: memref<2x8x8xi32, #tpu.memory_space<vmem>>, %arg4: memref<32x32xbf16, #tpu.memory_space<vmem>>, %arg5: memref<1x32xf32, #tpu.memory_space<vmem>>, %arg6: memref<32x32xbf16, #tpu.memory_space<vmem>>, %arg7: memref<1x32xf32, #tpu.memory_space<vmem>>, %arg8: memref<32x32xbf16, #tpu.memory_space<vmem>>, %arg9: memref<1x32xf32, #tpu.memory_space<vmem>>, %arg10: memref<4x8x32xbf16, #tpu.memory_space<vmem>>, %arg11: memref<1x32xf32, #tpu.memory_space<vmem>>, %arg12: memref<16x32xf32, #tpu.memory_space<vmem>>, %arg13: memref<2x256xf32, #tpu.memory_space<vmem>>) attributes {dimension_semantics = [], scalar_prefetch = 0 : i64, scratch_operands = 0 : i64, tpu.core_type = #tpu.core_type<tc>} {
    %c0 = arith.constant 0 : index
    %c0_0 = arith.constant 0 : index
    %0 = vector.load %arg0[%c0, %c0_0] : memref<16x32xf32, #tpu.memory_space<vmem>>, vector<16x32xf32>
    %1 = arith.truncf %0 : vector<16x32xf32> to vector<16x32xbf16>
    %c0_1 = arith.constant 0 : index
    %c0_2 = arith.constant 0 : index
    %2 = vector.load %arg1[%c0_1, %c0_2] : memref<16x32xf32, #tpu.memory_space<vmem>>, vector<16x32xf32>
    %3 = arith.truncf %2 : vector<16x32xf32> to vector<16x32xbf16>
    %c0_3 = arith.constant 0 : index
    %c0_4 = arith.constant 0 : index
    %4 = vector.load %arg2[%c0_3, %c0_4] : memref<16x32xf32, #tpu.memory_space<vmem>>, vector<16x32xf32>
    %5 = arith.truncf %4 : vector<16x32xf32> to vector<16x32xbf16>
    %c0_5 = arith.constant 0 : index
    %c0_6 = arith.constant 0 : index
    %6 = vector.load %arg4[%c0_5, %c0_6] : memref<32x32xbf16, #tpu.memory_space<vmem>>, vector<32x32xbf16>
    %cst = arith.constant dense<0.000000e+00> : vector<16x32xf32>
    %7 = tpu.matmul %1, %6, %cst {dimension_numbers = #tpu.dot_dimension_numbers<[1], [0], [0], [1], [0, 0, 1, 1], [], []>} : vector<16x32xbf16>, vector<32x32xbf16>, vector<16x32xf32> -> vector<16x32xf32>
    %c0_7 = arith.constant 0 : index
    %c0_8 = arith.constant 0 : index
    %8 = vector.load %arg5[%c0_7, %c0_8] : memref<1x32xf32, #tpu.memory_space<vmem>>, vector<1x32xf32>
    %9 = vector.broadcast %8 : vector<1x32xf32> to vector<16x32xf32>
    %10 = arith.addf %7, %9 : vector<16x32xf32>
    %c0_9 = arith.constant 0 : index
    %c0_10 = arith.constant 0 : index
    %11 = vector.load %arg6[%c0_9, %c0_10] : memref<32x32xbf16, #tpu.memory_space<vmem>>, vector<32x32xbf16>
    %cst_11 = arith.constant dense<0.000000e+00> : vector<16x32xf32>
    %12 = tpu.matmul %3, %11, %cst_11 {dimension_numbers = #tpu.dot_dimension_numbers<[1], [0], [0], [1], [0, 0, 1, 1], [], []>} : vector<16x32xbf16>, vector<32x32xbf16>, vector<16x32xf32> -> vector<16x32xf32>
    %c0_12 = arith.constant 0 : index
    %c0_13 = arith.constant 0 : index
    %13 = vector.load %arg7[%c0_12, %c0_13] : memref<1x32xf32, #tpu.memory_space<vmem>>, vector<1x32xf32>
    %14 = vector.broadcast %13 : vector<1x32xf32> to vector<16x32xf32>
    %15 = arith.addf %12, %14 : vector<16x32xf32>
    %c0_14 = arith.constant 0 : index
    %c0_15 = arith.constant 0 : index
    %16 = vector.load %arg8[%c0_14, %c0_15] : memref<32x32xbf16, #tpu.memory_space<vmem>>, vector<32x32xbf16>
    %cst_16 = arith.constant dense<0.000000e+00> : vector<16x32xf32>
    %17 = tpu.matmul %5, %16, %cst_16 {dimension_numbers = #tpu.dot_dimension_numbers<[1], [0], [0], [1], [0, 0, 1, 1], [], []>} : vector<16x32xbf16>, vector<32x32xbf16>, vector<16x32xf32> -> vector<16x32xf32>
    %c0_17 = arith.constant 0 : index
    %c0_18 = arith.constant 0 : index
    %18 = vector.load %arg9[%c0_17, %c0_18] : memref<1x32xf32, #tpu.memory_space<vmem>>, vector<1x32xf32>
    %19 = vector.broadcast %18 : vector<1x32xf32> to vector<16x32xf32>
    %20 = arith.addf %17, %19 : vector<16x32xf32>
    %21 = arith.truncf %20 : vector<16x32xf32> to vector<16x32xbf16>
    %c0_19 = arith.constant 0 : index
    %c0_20 = arith.constant 0 : index
    %c0_21 = arith.constant 0 : index
    %22 = vector.load %arg3[%c0_19, %c0_20, %c0_21] : memref<2x8x8xi32, #tpu.memory_space<vmem>>, vector<2x8x8xi32>
    %c0_i32 = arith.constant 0 : i32
    %23 = vector.broadcast %c0_i32 : i32 to vector<2x8x8xi32>
    %24 = arith.cmpi sgt, %22, %23 : vector<2x8x8xi32>
    %cst_22 = arith.constant -1.000000e+09 : f32
    %cst_23 = arith.constant 0.000000e+00 : f32
    %25 = vector.broadcast %cst_22 : f32 to vector<2x8x8xf32>
    %26 = vector.broadcast %cst_23 : f32 to vector<2x8x8xf32>
    %27 = arith.select %24, %25, %26 : vector<2x8x8xi1>, vector<2x8x8xf32>
    %cst_24 = arith.constant 0.000000e+00 : f32
    %28 = vector.broadcast %cst_24 : f32 to vector<16x32xf32>
    %29 = vector.extract_strided_slice %10 {offsets = [0, 0], sizes = [16, 8], strides = [1, 1]} : vector<16x32xf32> to vector<16x8xf32>
    %30 = vector.shape_cast %29 : vector<16x8xf32> to vector<2x8x8xf32>
    %31 = vector.extract_strided_slice %15 {offsets = [0, 0], sizes = [16, 8], strides = [1, 1]} : vector<16x32xf32> to vector<16x8xf32>
    %32 = vector.shape_cast %31 : vector<16x8xf32> to vector<2x8x8xf32>
    %33 = vector.extract_strided_slice %21 {offsets = [0, 0], sizes = [16, 8], strides = [1, 1]} : vector<16x32xbf16> to vector<16x8xbf16>
    %34 = vector.shape_cast %33 : vector<16x8xbf16> to vector<2x8x8xbf16>
    %cst_25 = arith.constant dense<0.000000e+00> : vector<2x8x8xf32>
    %35 = tpu.matmul %30, %32, %cst_25 {dimension_numbers = #tpu.dot_dimension_numbers<[2], [2], [1], [1], [0, 0, 0, 1, 1, 1], [0], [0]>} : vector<2x8x8xf32>, vector<2x8x8xf32>, vector<2x8x8xf32> -> vector<2x8x8xf32>
    %36 = arith.addf %35, %27 : vector<2x8x8xf32>
    %cst_26 = arith.constant dense<0xFF800000> : vector<2x8xf32>
    %37 = vector.multi_reduction <maximumf>, %36, %cst_26 [2] : vector<2x8x8xf32> to vector<2x8xf32>
    %38 = vector.shape_cast %37 : vector<2x8xf32> to vector<2x8x1xf32>
    %39 = vector.broadcast %38 : vector<2x8x1xf32> to vector<2x8x8xf32>
    %40 = arith.subf %36, %39 : vector<2x8x8xf32>
    %41 = math.exp %40 : vector<2x8x8xf32>
    %cst_27 = arith.constant dense<0.000000e+00> : vector<2x8xf32>
    %42 = vector.multi_reduction <add>, %41, %cst_27 [2] : vector<2x8x8xf32> to vector<2x8xf32>
    %43 = vector.shape_cast %42 : vector<2x8xf32> to vector<2x8x1xf32>
    %44 = tpu.reciprocal %43 {approx = true} : vector<2x8x1xf32> -> vector<2x8x1xf32>
    %45 = vector.broadcast %44 : vector<2x8x1xf32> to vector<2x8x8xf32>
    %46 = arith.mulf %41, %45 : vector<2x8x8xf32>
    %47 = arith.truncf %46 : vector<2x8x8xf32> to vector<2x8x8xbf16>
    %cst_28 = arith.constant dense<0.000000e+00> : vector<2x8x8xf32>
    %48 = tpu.matmul %47, %34, %cst_28 {dimension_numbers = #tpu.dot_dimension_numbers<[2], [1], [1], [2], [0, 0, 0, 1, 1, 2], [0], [0]>} : vector<2x8x8xbf16>, vector<2x8x8xbf16>, vector<2x8x8xf32> -> vector<2x8x8xf32>
    %49 = vector.shape_cast %48 : vector<2x8x8xf32> to vector<16x8xf32>
    %50 = arith.truncf %49 : vector<16x8xf32> to vector<16x8xbf16>
    %c0_29 = arith.constant 0 : index
    %c0_30 = arith.constant 0 : index
    %c0_31 = arith.constant 0 : index
    %51 = vector.load %arg10[%c0_29, %c0_30, %c0_31] : memref<4x8x32xbf16, #tpu.memory_space<vmem>>, vector<1x8x32xbf16>
    %52 = vector.shape_cast %51 : vector<1x8x32xbf16> to vector<8x32xbf16>
    %cst_32 = arith.constant dense<0.000000e+00> : vector<16x32xf32>
    %53 = tpu.matmul %50, %52, %cst_32 {dimension_numbers = #tpu.dot_dimension_numbers<[1], [0], [0], [1], [0, 0, 1, 1], [], []>} : vector<16x8xbf16>, vector<8x32xbf16>, vector<16x32xf32> -> vector<16x32xf32>
    %54 = arith.addf %28, %53 : vector<16x32xf32>
    %55 = vector.shape_cast %46 : vector<2x8x8xf32> to vector<2x64xf32>
    %56 = vector.extract_strided_slice %10 {offsets = [0, 8], sizes = [16, 8], strides = [1, 1]} : vector<16x32xf32> to vector<16x8xf32>
    %57 = vector.shape_cast %56 : vector<16x8xf32> to vector<2x8x8xf32>
    %58 = vector.extract_strided_slice %15 {offsets = [0, 8], sizes = [16, 8], strides = [1, 1]} : vector<16x32xf32> to vector<16x8xf32>
    %59 = vector.shape_cast %58 : vector<16x8xf32> to vector<2x8x8xf32>
    %60 = vector.extract_strided_slice %21 {offsets = [0, 8], sizes = [16, 8], strides = [1, 1]} : vector<16x32xbf16> to vector<16x8xbf16>
    %61 = vector.shape_cast %60 : vector<16x8xbf16> to vector<2x8x8xbf16>
    %cst_33 = arith.constant dense<0.000000e+00> : vector<2x8x8xf32>
    %62 = tpu.matmul %57, %59, %cst_33 {dimension_numbers = #tpu.dot_dimension_numbers<[2], [2], [1], [1], [0, 0, 0, 1, 1, 1], [0], [0]>} : vector<2x8x8xf32>, vector<2x8x8xf32>, vector<2x8x8xf32> -> vector<2x8x8xf32>
    %63 = arith.addf %62, %27 : vector<2x8x8xf32>
    %cst_34 = arith.constant dense<0xFF800000> : vector<2x8xf32>
    %64 = vector.multi_reduction <maximumf>, %63, %cst_34 [2] : vector<2x8x8xf32> to vector<2x8xf32>
    %65 = vector.shape_cast %64 : vector<2x8xf32> to vector<2x8x1xf32>
    %66 = vector.broadcast %65 : vector<2x8x1xf32> to vector<2x8x8xf32>
    %67 = arith.subf %63, %66 : vector<2x8x8xf32>
    %68 = math.exp %67 : vector<2x8x8xf32>
    %cst_35 = arith.constant dense<0.000000e+00> : vector<2x8xf32>
    %69 = vector.multi_reduction <add>, %68, %cst_35 [2] : vector<2x8x8xf32> to vector<2x8xf32>
    %70 = vector.shape_cast %69 : vector<2x8xf32> to vector<2x8x1xf32>
    %71 = tpu.reciprocal %70 {approx = true} : vector<2x8x1xf32> -> vector<2x8x1xf32>
    %72 = vector.broadcast %71 : vector<2x8x1xf32> to vector<2x8x8xf32>
    %73 = arith.mulf %68, %72 : vector<2x8x8xf32>
    %74 = arith.truncf %73 : vector<2x8x8xf32> to vector<2x8x8xbf16>
    %cst_36 = arith.constant dense<0.000000e+00> : vector<2x8x8xf32>
    %75 = tpu.matmul %74, %61, %cst_36 {dimension_numbers = #tpu.dot_dimension_numbers<[2], [1], [1], [2], [0, 0, 0, 1, 1, 2], [0], [0]>} : vector<2x8x8xbf16>, vector<2x8x8xbf16>, vector<2x8x8xf32> -> vector<2x8x8xf32>
    %76 = vector.shape_cast %75 : vector<2x8x8xf32> to vector<16x8xf32>
    %77 = arith.truncf %76 : vector<16x8xf32> to vector<16x8xbf16>
    %c1 = arith.constant 1 : index
    %c0_37 = arith.constant 0 : index
    %c0_38 = arith.constant 0 : index
    %78 = vector.load %arg10[%c1, %c0_37, %c0_38] : memref<4x8x32xbf16, #tpu.memory_space<vmem>>, vector<1x8x32xbf16>
    %79 = vector.shape_cast %78 : vector<1x8x32xbf16> to vector<8x32xbf16>
    %cst_39 = arith.constant dense<0.000000e+00> : vector<16x32xf32>
    %80 = tpu.matmul %77, %79, %cst_39 {dimension_numbers = #tpu.dot_dimension_numbers<[1], [0], [0], [1], [0, 0, 1, 1], [], []>} : vector<16x8xbf16>, vector<8x32xbf16>, vector<16x32xf32> -> vector<16x32xf32>
    %81 = arith.addf %54, %80 : vector<16x32xf32>
    %82 = vector.shape_cast %73 : vector<2x8x8xf32> to vector<2x64xf32>
    %83 = vector.extract_strided_slice %10 {offsets = [0, 16], sizes = [16, 8], strides = [1, 1]} : vector<16x32xf32> to vector<16x8xf32>
    %84 = vector.shape_cast %83 : vector<16x8xf32> to vector<2x8x8xf32>
    %85 = vector.extract_strided_slice %15 {offsets = [0, 16], sizes = [16, 8], strides = [1, 1]} : vector<16x32xf32> to vector<16x8xf32>
    %86 = vector.shape_cast %85 : vector<16x8xf32> to vector<2x8x8xf32>
    %87 = vector.extract_strided_slice %21 {offsets = [0, 16], sizes = [16, 8], strides = [1, 1]} : vector<16x32xbf16> to vector<16x8xbf16>
    %88 = vector.shape_cast %87 : vector<16x8xbf16> to vector<2x8x8xbf16>
    %cst_40 = arith.constant dense<0.000000e+00> : vector<2x8x8xf32>
    %89 = tpu.matmul %84, %86, %cst_40 {dimension_numbers = #tpu.dot_dimension_numbers<[2], [2], [1], [1], [0, 0, 0, 1, 1, 1], [0], [0]>} : vector<2x8x8xf32>, vector<2x8x8xf32>, vector<2x8x8xf32> -> vector<2x8x8xf32>
    %90 = arith.addf %89, %27 : vector<2x8x8xf32>
    %cst_41 = arith.constant dense<0xFF800000> : vector<2x8xf32>
    %91 = vector.multi_reduction <maximumf>, %90, %cst_41 [2] : vector<2x8x8xf32> to vector<2x8xf32>
    %92 = vector.shape_cast %91 : vector<2x8xf32> to vector<2x8x1xf32>
    %93 = vector.broadcast %92 : vector<2x8x1xf32> to vector<2x8x8xf32>
    %94 = arith.subf %90, %93 : vector<2x8x8xf32>
    %95 = math.exp %94 : vector<2x8x8xf32>
    %cst_42 = arith.constant dense<0.000000e+00> : vector<2x8xf32>
    %96 = vector.multi_reduction <add>, %95, %cst_42 [2] : vector<2x8x8xf32> to vector<2x8xf32>
    %97 = vector.shape_cast %96 : vector<2x8xf32> to vector<2x8x1xf32>
    %98 = tpu.reciprocal %97 {approx = true} : vector<2x8x1xf32> -> vector<2x8x1xf32>
    %99 = vector.broadcast %98 : vector<2x8x1xf32> to vector<2x8x8xf32>
    %100 = arith.mulf %95, %99 : vector<2x8x8xf32>
    %101 = arith.truncf %100 : vector<2x8x8xf32> to vector<2x8x8xbf16>
    %cst_43 = arith.constant dense<0.000000e+00> : vector<2x8x8xf32>
    %102 = tpu.matmul %101, %88, %cst_43 {dimension_numbers = #tpu.dot_dimension_numbers<[2], [1], [1], [2], [0, 0, 0, 1, 1, 2], [0], [0]>} : vector<2x8x8xbf16>, vector<2x8x8xbf16>, vector<2x8x8xf32> -> vector<2x8x8xf32>
    %103 = vector.shape_cast %102 : vector<2x8x8xf32> to vector<16x8xf32>
    %104 = arith.truncf %103 : vector<16x8xf32> to vector<16x8xbf16>
    %c2 = arith.constant 2 : index
    %c0_44 = arith.constant 0 : index
    %c0_45 = arith.constant 0 : index
    %105 = vector.load %arg10[%c2, %c0_44, %c0_45] : memref<4x8x32xbf16, #tpu.memory_space<vmem>>, vector<1x8x32xbf16>
    %106 = vector.shape_cast %105 : vector<1x8x32xbf16> to vector<8x32xbf16>
    %cst_46 = arith.constant dense<0.000000e+00> : vector<16x32xf32>
    %107 = tpu.matmul %104, %106, %cst_46 {dimension_numbers = #tpu.dot_dimension_numbers<[1], [0], [0], [1], [0, 0, 1, 1], [], []>} : vector<16x8xbf16>, vector<8x32xbf16>, vector<16x32xf32> -> vector<16x32xf32>
    %108 = arith.addf %81, %107 : vector<16x32xf32>
    %109 = vector.shape_cast %100 : vector<2x8x8xf32> to vector<2x64xf32>
    %110 = vector.extract_strided_slice %10 {offsets = [0, 24], sizes = [16, 8], strides = [1, 1]} : vector<16x32xf32> to vector<16x8xf32>
    %111 = vector.shape_cast %110 : vector<16x8xf32> to vector<2x8x8xf32>
    %112 = vector.extract_strided_slice %15 {offsets = [0, 24], sizes = [16, 8], strides = [1, 1]} : vector<16x32xf32> to vector<16x8xf32>
    %113 = vector.shape_cast %112 : vector<16x8xf32> to vector<2x8x8xf32>
    %114 = vector.extract_strided_slice %21 {offsets = [0, 24], sizes = [16, 8], strides = [1, 1]} : vector<16x32xbf16> to vector<16x8xbf16>
    %115 = vector.shape_cast %114 : vector<16x8xbf16> to vector<2x8x8xbf16>
    %cst_47 = arith.constant dense<0.000000e+00> : vector<2x8x8xf32>
    %116 = tpu.matmul %111, %113, %cst_47 {dimension_numbers = #tpu.dot_dimension_numbers<[2], [2], [1], [1], [0, 0, 0, 1, 1, 1], [0], [0]>} : vector<2x8x8xf32>, vector<2x8x8xf32>, vector<2x8x8xf32> -> vector<2x8x8xf32>
    %117 = arith.addf %116, %27 : vector<2x8x8xf32>
    %cst_48 = arith.constant dense<0xFF800000> : vector<2x8xf32>
    %118 = vector.multi_reduction <maximumf>, %117, %cst_48 [2] : vector<2x8x8xf32> to vector<2x8xf32>
    %119 = vector.shape_cast %118 : vector<2x8xf32> to vector<2x8x1xf32>
    %120 = vector.broadcast %119 : vector<2x8x1xf32> to vector<2x8x8xf32>
    %121 = arith.subf %117, %120 : vector<2x8x8xf32>
    %122 = math.exp %121 : vector<2x8x8xf32>
    %cst_49 = arith.constant dense<0.000000e+00> : vector<2x8xf32>
    %123 = vector.multi_reduction <add>, %122, %cst_49 [2] : vector<2x8x8xf32> to vector<2x8xf32>
    %124 = vector.shape_cast %123 : vector<2x8xf32> to vector<2x8x1xf32>
    %125 = tpu.reciprocal %124 {approx = true} : vector<2x8x1xf32> -> vector<2x8x1xf32>
    %126 = vector.broadcast %125 : vector<2x8x1xf32> to vector<2x8x8xf32>
    %127 = arith.mulf %122, %126 : vector<2x8x8xf32>
    %128 = arith.truncf %127 : vector<2x8x8xf32> to vector<2x8x8xbf16>
    %cst_50 = arith.constant dense<0.000000e+00> : vector<2x8x8xf32>
    %129 = tpu.matmul %128, %115, %cst_50 {dimension_numbers = #tpu.dot_dimension_numbers<[2], [1], [1], [2], [0, 0, 0, 1, 1, 2], [0], [0]>} : vector<2x8x8xbf16>, vector<2x8x8xbf16>, vector<2x8x8xf32> -> vector<2x8x8xf32>
    %130 = vector.shape_cast %129 : vector<2x8x8xf32> to vector<16x8xf32>
    %131 = arith.truncf %130 : vector<16x8xf32> to vector<16x8xbf16>
    %c3 = arith.constant 3 : index
    %c0_51 = arith.constant 0 : index
    %c0_52 = arith.constant 0 : index
    %132 = vector.load %arg10[%c3, %c0_51, %c0_52] : memref<4x8x32xbf16, #tpu.memory_space<vmem>>, vector<1x8x32xbf16>
    %133 = vector.shape_cast %132 : vector<1x8x32xbf16> to vector<8x32xbf16>
    %cst_53 = arith.constant dense<0.000000e+00> : vector<16x32xf32>
    %134 = tpu.matmul %131, %133, %cst_53 {dimension_numbers = #tpu.dot_dimension_numbers<[1], [0], [0], [1], [0, 0, 1, 1], [], []>} : vector<16x8xbf16>, vector<8x32xbf16>, vector<16x32xf32> -> vector<16x32xf32>
    %135 = arith.addf %108, %134 : vector<16x32xf32>
    %136 = vector.shape_cast %127 : vector<2x8x8xf32> to vector<2x64xf32>
    %c0_54 = arith.constant 0 : index
    %c0_55 = arith.constant 0 : index
    %137 = vector.load %arg11[%c0_54, %c0_55] : memref<1x32xf32, #tpu.memory_space<vmem>>, vector<1x32xf32>
    %138 = vector.broadcast %137 : vector<1x32xf32> to vector<16x32xf32>
    %139 = arith.addf %135, %138 : vector<16x32xf32>
    %c0_56 = arith.constant 0 : index
    %c0_57 = arith.constant 0 : index
    %140 = vector.load %arg12[%c0_56, %c0_57] : memref<16x32xf32, #tpu.memory_space<vmem>>, vector<16x32xf32>
    tpu.vector_store %arg12[%c0_56, %c0_57], %139 {strides = array<i32>} : memref<16x32xf32, #tpu.memory_space<vmem>>, vector<16x32xf32>,
    %141 = tpu.concatenate %55, %82, %109, %136 in 1 : vector<2x64xf32>, vector<2x64xf32>, vector<2x64xf32>, vector<2x64xf32> -> vector<2x256xf32>
    %c0_58 = arith.constant 0 : index
    %c0_59 = arith.constant 0 : index
    %142 = vector.load %arg13[%c0_58, %c0_59] : memref<2x256xf32, #tpu.memory_space<vmem>>, vector<2x256xf32>
    tpu.vector_store %arg13[%c0_58, %c0_59], %141 {strides = array<i32>} : memref<2x256xf32, #tpu.memory_space<vmem>>, vector<2x256xf32>,
    return
  }
}

</mosaic_0001>

<bundles_post_ra>
// kernel: multi_head_attention.1
= control target key start
LH: loop header
LB: loop body
LE: loop exit
PB: predicated region body
PF: predicated region fallthrough
CT: control target
= control target key end

     0   :  { %19 = vsyncpa [#allocation3], 0  ;;  %s3206_s0 = inlined_call_operand.vmem [shape: f32[16,32], index: 0, kind: input, shape index: {}]   ;;  %s3207_s1 = inlined_call_operand.hbm [shape: f32[16,32], index: 1, kind: input, shape index: {}]   ;;  %s3208_s2 = inlined_call_operand.hbm [shape: f32[16,32], index: 2, kind: input, shape index: {}]   ;;  %s3209_s3 = inlined_call_operand.hbm [shape: s32[2,8,8], index: 3, kind: input, shape index: {}]   ;;  %s3210_s4 = inlined_call_operand.hbm [shape: bf16[32,32], index: 4, kind: input, shape index: {}]   ;;  %s3211_s5 = inlined_call_operand.vmem [shape: f32[1,32], index: 5, kind: input, shape index: {}]   ;;  %s3212_s6 = inlined_call_operand.hbm [shape: bf16[32,32], index: 6, kind: input, shape index: {}]   ;;  %s3213_s7 = inlined_call_operand.vmem [shape: f32[1,32], index: 7, kind: input, shape index: {}]   ;;  %s3214_s8 = inlined_call_operand.hbm [shape: bf16[32,32], index: 8, kind: input, shape index: {}]   ;;  %s3215_s9 = inlined_call_operand.vmem [shape: f32[1,32], index: 9, kind: input, shape index: {}]   ;;  %s3216_s10 = inlined_call_operand.hbm [shape: bf16[4,8,32], index: 10, kind: input, shape index: {}]   ;;  %s3217_s11 = inlined_call_operand.vmem [shape: f32[1,32], index: 11, kind: input, shape index: {}]   ;;  %s3218_s12 = inlined_call_operand.hbm [shape: f32[16,32], index: 12, kind: output, shape index: {0}]   ;;  %s3219_s13 = inlined_call_operand.vmem [shape: f32[2,256], index: 13, kind: output, shape index: {1}]  }
   0x1   :  { %20 = vsyncpa [#allocation6], 0 }
   0x2   :  { %21 = vsyncpa [#allocation9], 0 }
   0x3   :  { %22 = vsyncpa [#allocation12], 0 }
   0x4   :  { %23 = vsyncpa [#allocation4], 0  ;;  %s2595_s25 = smov [#allocation5]   ;;  %s2596_s27 = smov [#allocation8]  }
   0x5   :  { %s43_s26 = sshll.u32 %s2595_s25, 4  ;;  %s67_s28 = sshll.u32 %s2596_s27, 4  ;;  %s44_s26 = int_to_ptr.vmem [resolvable:$true] %s43_s26  ;;  %s68_s28 = int_to_ptr.vmem [resolvable:$true] %s67_s28 }
   0x6   :  { %s2433_s29 = scalar_lea.vmem %s44_s26, 256  ;;  %p2438_p1 = scmp.lt.s32.totalorder %s44_s26, %s44_s26 }
   0x7   :  { %p2434_p0 = scmp.ne.s32.totalorder %s44_s26, %s2433_s29  ;;  %p2439_p2 = scmp.lt.s32.totalorder %s2433_s29, %s2433_s29 }
   0x9   :  { %p2440_p3 = por %p2439_p2, %p2438_p1 }
   0xb   :  { %p2441_p4 = pnand %p2440_p3, %p2434_p0 }
   0xd   :  { %2444 = shalt.err (!%p2441_p4)
}
   0xe   :  { %s2597_s30 = smov 128   ;;  %s2598_s14 = smov 8  }
   0xf   :  { %49 = dma.hbm_to_vmem [thread:$0]  %s3208_s2, 256, %s44_s26, [#allocation6], %s2597_s30, %s2597_s30, %s2598_s14  }
  0x10   :  { %s2453_s17 = scalar_lea.vmem %s68_s28, 256  ;;  %p2458_p6 = scmp.lt.s32.totalorder %s68_s28, %s68_s28 }
  0x11   :  { %p2454_p5 = scmp.ne.s32.totalorder %s68_s28, %s2453_s17  ;;  %p2459_p7 = scmp.lt.s32.totalorder %s2453_s17, %s2453_s17 }
  0x13   :  { %p2460_p8 = por %p2459_p7, %p2458_p6 }
  0x15   :  { %p2461_p9 = pnand %p2460_p8, %p2454_p5 }
  0x17   :  { %2464 = shalt.err (!%p2461_p9)
}
  0x18   :  { %s2599_s18 = smov 64   ;;  %s2600_s19 = smov 4  }
  0x19   :  { %73 = dma.hbm_to_vmem [thread:$0]  %s3210_s4, 256, %s68_s28, [#allocation9], %s2599_s18, %s2599_s18, %s2600_s19  }
  0x1a   :  { %s2601_s22 = smov [#allocation11]   ;;  %s2602_s24 = smov [#allocation2]  }
  0x1b   :  { %s95_s23 = sshll.u32 %s2601_s22, 4  ;;  %s31_s2 = sshll.u32 %s2602_s24, 4  ;;  %s96_s23 = int_to_ptr.vmem [resolvable:$true] %s95_s23  ;;  %s32_s2 = int_to_ptr.vmem [resolvable:$true] %s31_s2 }
  0x1c   :  { %s2473_s25 = scalar_lea.vmem %s96_s23, 256  ;;  %p2478_p11 = scmp.lt.s32.totalorder %s96_s23, %s96_s23 }
  0x1d   :  { %p2474_p10 = scmp.ne.s32.totalorder %s96_s23, %s2473_s25  ;;  %p2479_p12 = scmp.lt.s32.totalorder %s2473_s25, %s2473_s25 }
  0x1f   :  { %p2480_p13 = por %p2479_p12, %p2478_p11 }
  0x21   :  { %p2481_p0 = pnand %p2480_p13, %p2474_p10 }
  0x23   :  { %2484 = shalt.err (!%p2481_p0)
}
  0x24   :  { %101 = dma.hbm_to_vmem [thread:$0]  %s3214_s8, 256, %s96_s23, [#allocation12], %s2599_s18, %s2599_s18, %s2600_s19  }
  0x25   :  { %s2493_s4 = scalar_lea.vmem %s32_s2, 256  ;;  %p2498_p2 = scmp.lt.s32.totalorder %s32_s2, %s32_s2 }
  0x26   :  { %p2494_p1 = scmp.ne.s32.totalorder %s32_s2, %s2493_s4  ;;  %p2499_p3 = scmp.lt.s32.totalorder %s2493_s4, %s2493_s4 }
  0x28   :  { %p2500_p4 = por %p2499_p3, %p2498_p2 }
  0x2a   :  { %p2501_p5 = pnand %p2500_p4, %p2494_p1 }
  0x2c   :  { %2504 = shalt.err (!%p2501_p5)
}
  0x2d   :  { %37 = dma.hbm_to_vmem [thread:$0]  %s3207_s1, 256, %s32_s2, [#allocation3], %s2597_s30, %s2597_s30, %s2598_s14  }
  0x2e   :  { %s2603_s15 = smov [#allocation7]   ;;  %s2604_s17 = smov [#allocation10]  }
  0x2f   :  { %s55_s16 = sshll.u32 %s2603_s15, 4  ;;  %s81_s20 = sshll.u32 %s2604_s17, 4  ;;  %s56_s16 = int_to_ptr.vmem [resolvable:$true] %s55_s16  ;;  %s82_s20 = int_to_ptr.vmem [resolvable:$true] %s81_s20 }
  0x30   :  { %s2513_s8 = scalar_lea.vmem %s56_s16, 256  ;;  %p2518_p7 = scmp.lt.s32.totalorder %s56_s16, %s56_s16 }
  0x31   :  { %p2514_p6 = scmp.ne.s32.totalorder %s56_s16, %s2513_s8  ;;  %p2519_p8 = scmp.lt.s32.totalorder %s2513_s8, %s2513_s8 }
  0x33   :  { %p2520_p9 = por %p2519_p8, %p2518_p7 }
  0x35   :  { %p2521_p10 = pnand %p2520_p9, %p2514_p6 }
  0x37   :  { %2524 = shalt.err (!%p2521_p10)
}
  0x38   :  { %61 = dma.hbm_to_vmem [thread:$0]  %s3209_s3, 256, %s56_s16, [#allocation6], %s2597_s30, %s2597_s30, %s2598_s14  }
  0x39   :  { %s2533_s1 = scalar_lea.vmem %s82_s20, 256  ;;  %p2538_p12 = scmp.lt.s32.totalorder %s82_s20, %s82_s20 }
  0x3a   :  { %p2534_p11 = scmp.ne.s32.totalorder %s82_s20, %s2533_s1  ;;  %p2539_p13 = scmp.lt.s32.totalorder %s2533_s1, %s2533_s1 }
  0x3c   :  { %p2540_p0 = por %p2539_p13, %p2538_p12 }
  0x3e   :  { %p2541_p1 = pnand %p2540_p0, %p2534_p11 }
  0x40   :  { %2544 = shalt.err (!%p2541_p1)
}
  0x41   :  { %87 = dma.hbm_to_vmem [thread:$0]  %s3212_s6, 256, %s82_s20, [#allocation9], %s2599_s18, %s2599_s18, %s2600_s19  }
  0x42   :  { %s2605_s2 = smov [#allocation13]  }
  0x43   :  { %s109_s25 = sshll.u32 %s2605_s2, 4  ;;  %s110_s25 = int_to_ptr.vmem [resolvable:$true] %s109_s25 }
  0x44   :  { %s2553_s26 = scalar_lea.vmem %s110_s25, 256  ;;  %p2558_p3 = scmp.lt.s32.totalorder %s110_s25, %s110_s25 }
  0x45   :  { %p2554_p2 = scmp.ne.s32.totalorder %s110_s25, %s2553_s26  ;;  %p2559_p4 = scmp.lt.s32.totalorder %s2553_s26, %s2553_s26 }
  0x47   :  { %p2560_p5 = por %p2559_p4, %p2558_p3 }
  0x49   :  { %p2561_p6 = pnand %p2560_p5, %p2554_p2 }
  0x4b   :  { %2564 = shalt.err (!%p2561_p6)
}
  0x4c   :  { %115 = dma.hbm_to_vmem [thread:$0]  %s3216_s10, 256, %s110_s25, [#allocation12], %s2599_s18, %s2599_s18, %s2600_s19  }
  0x4d   :  { %2585 = dma.done.wait [#allocation3], 256  }
  0x4e   :  { %2586 = vsyncadd [#allocation3], 4294967040 }
  0x4f   :  { %2587 = dma.done.wait [#allocation6], 512  }
  0x50   :  { %2588 = vsyncadd [#allocation6], 4294966784 }
  0x51   :  { %2589 = dma.done.wait [#allocation9], 512  }
  0x52   :  { %2590 = vsyncadd [#allocation9], 4294966784 }
  0x53   :  { %2591 = dma.done.wait [#allocation12], 512  }
  0x54   :  { %2592 = vsyncadd [#allocation12], 4294966784  ;;  %v2606_v0 = vmov 0.0   ;;  %vm2607_vm0 = vmmov 0   ;;  %v2387_v1 = vld [vmem:[#allocation10 + $0x8] sm:$0xff]   ;;  %v2388_v2 = vld [vmem:[#allocation8 + $0x8] sm:$0xff]  }
  0x55   :  { %2234 = vmatprep.subr.bf16.mxu1 %v2606_v0  ;;  %2226 = vmatprep.subr.bf16.mxu0 %v2606_v0  ;;  %v2389_v3 = vld [vmem:[#allocation10] sm:$0xff]   ;;  %v2390_v4 = vld [vmem:[#allocation8] sm:$0xff]   ;;  %v144_v6 = vld [vmem:[#allocation2 + $0x8] sm:$0xff]  ;;  %vm172_vm1 = vcmask 261120   ;;  %vm363_vm2 = vcmask 64512   ;;  %s2608_s16 = smov 120  }
  0x56   :  { %2238 = vmatprep.mubr.msk.bf16.mxu1 %vm2607_vm0, %v2606_v0  ;;  %2230 = vmatprep.mubr.msk.bf16.mxu0 %vm2607_vm0, %v2606_v0  ;;  %v143_v5 = vld [vmem:[#allocation2] sm:$0xff]  ;;  %v141_v9 = vld [vmem:[%s3206_s0 + $0x8] sm:$0xff]  ;;  %v2391_v25 = vld [vmem:[#allocation11 + $0x8] sm:$0xff]   ;;  %vm543_vm5 = vcmask 1043456   ;;  %s2611_s17 = smov 104   ;;  %s2613_s20 = smov 16  }
  0x57   :  { %2235 = vmatpush3.bf16.msra.mxu1 %v2387_v1  ;;  %2227 = vmatpush3.bf16.msra.mxu0 %v2388_v2  ;;  %v140_v7 = vld [vmem:[%s3206_s0] sm:$0xff]  ;;  %v145_v8 = vpack.c.bf16 %v144_v6, %v143_v5  ;;  %v2392_v26 = vld [vmem:[#allocation11] sm:$0xff]   ;;  %v147_v28 = vld [vmem:[#allocation5 + $0x8] sm:$0xff]  ;;  %s2614_s8 = smov 24   ;;  %s2615_s21 = smov 32   ;;  %vm730_vm6 = vcmask 130048  }
  0x58   :  { %2236 = vmatprep.subr.bf16.mxu1 %v2606_v0  ;;  %2228 = vmatprep.subr.bf16.mxu0 %v2606_v0  ;;  %v142_v10 = vpack.c.bf16 %v141_v9, %v140_v7  ;;  %v2135_v11 = vld [vmem:[%s3213_s7] ss:$0 sm:$0xff]  ;;  %v146_v27 = vld [vmem:[#allocation5] sm:$0xff]  ;;  %v353_v31 = vld [vmem:[#allocation7 + $0x8] sm:$0xff]  ;;  %v2610_v9 = vmov 1983009808  }
  0x59   :  { %v2131_v12 = vld [vmem:[%s3211_s5] ss:$0 sm:$0xff]  ;;  %v148_v29 = vpack.c.bf16 %v147_v28, %v146_v27  ;;  %vm355_vm4 = vcmp.gt.s32.totalorder %v353_v31, 0  ;;  %s2616_s22 = smov 40   ;;  %s2617_s1 = smov 48   ;;  %vm732_vm7 = vcmask 195584  }
  0x5a   :  { %v352_v30 = vld [vmem:[#allocation7] sm:$0xff]  ;;  %v2798_v36 = vsel %vm355_vm4, -1e+09, %v2606_v0  ;;  %s2618_s23 = smov 56   ;;  %vm735_vm8 = vcmask 326656   ;;  %vm737_vm9 = vcmask 392192  }
  0x5b   :  { %2237 = vmatpush3.bf16.msra.mxu1 %v2389_v3  ;;  %2229 = vmatpush3.bf16.msra.mxu0 %v2390_v4  ;;  %vm354_vm3 = vcmp.gt.s32.totalorder %v352_v30, 0  ;;  %v2139_v50 = vld [vmem:[%s3215_s9] ss:$0 sm:$0xff]  ;;  %s2609_s9 = smov 112   ;;  %vm739_vm10 = vcmask 457728   ;;  %vm2092_vm11 = vcmask 523264  }
  0x5c   :  { %2250 = vmatprep.subr.mxu1 %v2606_v0  ;;  %2242 = vmatprep.subr.bf16.mxu0 %v2606_v0  ;;  %v2794_v32 = vsel %vm354_vm3, -1e+09, %v2606_v0  ;;  %s2619_s26 = smov [#allocation14]  }
  0x5d   :  { %s2112_s3 = sshll.u32 %s2619_s26, 4  ;;  %s2113_s3 = int_to_ptr.vmem [resolvable:$true] %s2112_s3 }
  0x5e   :  { %2239 = vmatmul.mubr.msk.bf16.vlgmr.msra.gmra.mxu1 %vm172_vm1, %v145_v8  ;;  %2231 = vmatmul.mubr.msk.bf16.vlgmr.msra.gmra.mxu0 %vm172_vm1, %v142_v10  ;;  %v637_v10 = vunpack.c.l.s4 %v2610_v9  ;;  %v634_v9 = vld [vmem:[#allocation13] sm:$0xf]  ;;  %p2570_p8 = scmp.lt.s32.totalorder %s2113_s3, %s2113_s3 }
  0x5f   :  { %2252 = vmatprep.mubr.msk.f32.mxu1 %vm2607_vm0, %v2606_v0  ;;  %2246 = vmatprep.mubr.msk.bf16.mxu0 %vm2607_vm0, %v2606_v0 }
  0x60   :  { %2243 = vmatpush3.bf16.msra.mxu0 %v2391_v25 }
  0x61   :  { %2244 = vmatprep.subr.bf16.mxu0 %v2606_v0 }
  0x64   :  { %2245 = vmatpush3.bf16.msra.mxu0 %v2392_v26 }
  0x65   :  { %2260 = vmatprep.subr.bf16.mxu0 %v2606_v0 }
  0x67   :  { %2247 = vmatmul.mubr.msk.bf16.vlgmr.msra.gmra.mxu0 %vm172_vm1, %v148_v29 }
  0x68   :  { %2262 = vmatprep.mubr.msk.bf16.mxu0 %vm2607_vm0, %v2606_v0 }
 0x11e   :  { %v277_v13 = vpop.f32.mrf.mxu1  ;;  %v210_v15 = vpop.f32.mrf.mxu0 }
 0x11f   :  { %v2760_v14 = vadd.f32 %v2135_v11, %v277_v13  ;;  %v2762_v16 = vadd.f32 %v2131_v12, %v210_v15 }
 0x120   :  { %v2240_v17 = vpop.f32.mrf.mxu1  ;;  %v2232_v18 = vpop.f32.mrf.mxu0 }
 0x121   :  { %743 = vrot.lane.b32.xlu1 %v2760_v14, %s2608_s16  ;;  %2251 = vmatpush3.xpose.msk.msra.mxu1 %vm363_vm2, %v2760_v14 }
 0x122   :  { %v280_v19 = vpop.f32.mrf.mxu1  ;;  %2255 = vmatprep.subr.mxu1 %v2606_v0  ;;  %v213_v21 = vpop.f32.mrf.mxu0 }
 0x123   :  { %v2769_v20 = vadd.f32 %v2135_v11, %v280_v19  ;;  %v2777_v24 = vadd.f32 %v2131_v12, %v213_v21  ;;  %v639_v11 = vlaneseq  ;;  %v638_v12 = vunpack.c.0.s8 %v637_v10 }
 0x124   :  { %v2241_v22 = vpop.f32.mrf.mxu1  ;;  %2253 = vmatmul.mubr.msk.f32.vlgmr.msra.gmra.mxu1 %vm363_vm2, %v2762_v16  ;;  %v2233_v23 = vpop.f32.mrf.mxu0 }
 0x125   :  { %741 = vrot.lane.b32.xlu1 %v2762_v16, %s2608_s16  ;;  %2256 = vmatpush3.xpose.msk.msra.mxu1 %vm363_vm2, %v2769_v20  ;;  %v2839_v13 = vshrl.u32 %v639_v11, 7 }
 0x126   :  { %2257 = vmatprep.mubr.msk.f32.mxu1 %vm2607_vm0, %v2606_v0  ;;  %2266 = vmatprep.subr.bf16.mxu1 %v2606_v0 }
 0x127   :  { %v344_v42 = vpop.f32.mrf.mxu0  ;;  %v2842_v15 = vsub.s32 %v638_v12, %v2839_v13 }
 0x128   :  { %2258 = vmatmul.mubr.msk.f32.vlgmr.msra.gmra.mxu1 %vm363_vm2, %v2777_v24  ;;  %v345_v53 = vadd.f32 %v2139_v50, %v344_v42 }
 0x129   :  { %819 = vrot.lane.b32.xlu1 %v2777_v24, %s2608_s16  ;;  %2268 = vmatprep.mubr.msk.bf16.mxu1 %vm2607_vm0, %v2606_v0  ;;  %v2248_v43 = vpop.f32.mrf.mxu0 }
 0x12a   :  { %v2807_v56 = vpack.c.bf16 %v345_v53, %v345_v53 }
 0x12b   :  { %v347_v51 = vpop.f32.mrf.mxu0 }
 0x12c   :  { %v348_v55 = vadd.f32 %v2139_v50, %v347_v51  ;;  %v545_v60 = vsel %vm543_vm5, %v2807_v56, 0 }
 0x12d   :  { %v2249_v54 = vpop.f32.mrf.mxu0  ;;  %2261 = vmatpush3.bf16.msra.mxu0 %v545_v60 }
 0x12e   :  { %v2809_v57 = vpack.c.bf16 %v348_v55, %v348_v55  ;;  %2282 = vmatprep.subr.bf16.mxu0 %v2606_v0 }
 0x130   :  { %v591_v59 = vsel %vm543_vm5, %v2809_v57, 0 }
 0x131   :  { %2267 = vmatpush3.bf16.msra.mxu1 %v591_v59 }
 0x132   :  { %2272 = vmatprep.subr.mxu1 %v2606_v0 }
 0x193   :  { %v744_v49 = vpop.permute.xlu1 %743 }
 0x197   :  { %v742_v52 = vpop.permute.xlu1 %741 }
 0x19b   :  { %v820_v58 = vpop.permute.xlu1 %819 }
 0x1e4   :  { %v436_v33 = vpop.f32.mrf.mxu1 }
 0x1e5   :  { %v437_v34 = vadd.f32 %v436_v33, %v2794_v32 }
 0x1e6   :  { %v2254_v35 = vpop.f32.mrf.mxu1 }
 0x1e7   :  { %v516_v37 = vsel %vm363_vm2, %v437_v34, -inf }
 0x1e8   :  { %517 = vmax.xlane.f32.xlu1 %v516_v37  ;;  %v512_v38 = vpop.f32.mrf.mxu1 }
 0x1e9   :  { %v513_v39 = vadd.f32 %v512_v38, %v2798_v36 }
 0x1ea   :  { %v2259_v40 = vpop.f32.mrf.mxu1 }
 0x1eb   :  { %v519_v41 = vsel %vm363_vm2, %v513_v39, -inf }
 0x1ec   :  { %520 = vmax.xlane.f32.xlu0 %v519_v41 }
 0x271   :  { %v518_v61 = vpop.xlane.xlu1 %517 }
 0x272   :  { %v522_v62 = vsub.f32 %v437_v34, %v518_v61 }
 0x274   :  { %v524_v63 = vmul.f32 1.442695, %v522_v62 }
 0x275   :  { %v521_v44 = vpop.xlane.xlu0 %520 }
 0x276   :  { %v523_v45 = vsub.f32 %v513_v39, %v521_v44 }
 0x278   :  { %v526_v46 = vmul.f32 1.442695, %v523_v45 }
 0x27a   :  { %2393 = vpow2.f32 %v526_v46 }
 0x27b   :  { %2395 = vpow2.f32 %v524_v63 }
 0x287   :  { %v2394_v47 = vpop.eup %2393 }
 0x288   :  { %v531_v48 = vsel %vm363_vm2, %v2394_v47, 0.0  ;;  %v2396_v1 = vpop.eup %2395 }
 0x289   :  { %532 = vadd.xlane.f32.xlu0 %v531_v48  ;;  %v528_v2 = vsel %vm363_vm2, %v2396_v1, 0.0 }
 0x29f   :  { %821 = vrot.lane.b32.xlu0 %v2769_v20, %s2608_s16 }
 0x2be   :  { %529 = vadd.xlane.f32.xlu0 %v528_v2 }
 0x2d4   :  { %921 = vrot.lane.b32.xlu0 %v2807_v56, %s2608_s16 }
 0x2d8   :  { %1293 = vrot.lane.b32.xlu0 %v2777_v24, %s2609_s9 }
 0x2dc   :  { %1215 = vrot.lane.b32.xlu0 %v2762_v16, %s2609_s9 }
 0x312   :  { %v533_v3 = vpop.xlane.xlu0 %532 }
 0x313   :  { %2397 = vrcp.f32 %v533_v3 }
 0x316   :  { %v822_v7 = vpop.permute.xlu0 %821 }
 0x320   :  { %v2398_v4 = vpop.eup %2397 }
 0x321   :  { %v537_v5 = vmul.f32 %v2398_v4, %v2394_v47 }
 0x323   :  { %v539_v6 = vpack.c.bf16 %v537_v5, %v537_v5  ;;  %v650_v19 = vcombine.high %v537_v5, %v2606_v0  ;;  %v2846_v22 = vrot.slane %v537_v5, %v2842_v15 }
 0x325   :  { %2269 = vmatmul.mubr.msk.bf16.vlgmr.msra.gmra.mxu1 %vm363_vm2, %v539_v6  ;;  %v2862_v31 = vrot.slane %v650_v19, %v2842_v15 }
 0x326   :  { %2273 = vmatpush3.xpose.msk.msra.mxu1 %vm363_vm2, %v744_v49  ;;  %2274 = vmatprep.mubr.msk.f32.mxu1 %vm2607_vm0, %v2606_v0 }
 0x327   :  { %2277 = vmatprep.subr.mxu1 %v2606_v0 }
 0x32d   :  { %2275 = vmatmul.mubr.msk.f32.vlgmr.msra.gmra.mxu1 %vm363_vm2, %v742_v52 }
 0x32e   :  { %2278 = vmatpush3.xpose.msk.msra.mxu1 %vm363_vm2, %v822_v7  ;;  %2279 = vmatprep.mubr.msk.f32.mxu1 %vm2607_vm0, %v2606_v0 }
 0x32f   :  { %2288 = vmatprep.subr.bf16.mxu1 %v2606_v0 }
 0x331   :  { %2280 = vmatmul.mubr.msk.f32.vlgmr.msra.gmra.mxu1 %vm363_vm2, %v820_v58 }
 0x332   :  { %2290 = vmatprep.mubr.msk.bf16.mxu1 %vm2607_vm0, %v2606_v0 }
 0x347   :  { %v530_v8 = vpop.xlane.xlu0 %529 }
 0x348   :  { %2399 = vrcp.f32 %v530_v8 }
 0x34b   :  { %v922_v21 = vpop.permute.xlu0 %921 }
 0x34c   :  { %v927_v23 = vsel %vm543_vm5, %v922_v21, 0 }
 0x355   :  { %v2400_v17 = vpop.eup %2399 }
 0x356   :  { %v536_v18 = vmul.f32 %v2400_v17, %v2396_v1  ;;  %v1071_v17 = vsel %vm543_vm5, %v634_v9, 0 }
 0x358   :  { %v538_v25 = vpack.c.bf16 %v536_v18, %v536_v18  ;;  %v2850_v26 = vrot.slane %v536_v18, %v2842_v15  ;;  %v635_v27 = vcombine.high %v536_v18, %v2606_v0 }
 0x35a   :  { %2263 = vmatmul.mubr.msk.bf16.vlgmr.msra.gmra.mxu0 %vm363_vm2, %v538_v25  ;;  %v665_v28 = vcombine.low %v2850_v26, %v2846_v22  ;;  %v666_v29 = vcombine.high %v2850_v26, %v2846_v22  ;;  %v2859_v30 = vrot.slane %v635_v27, %v2842_v15 }
 0x35b   :  { %2283 = vmatpush3.bf16.msra.mxu0 %v927_v23  ;;  %2284 = vmatprep.mubr.msk.bf16.mxu0 %vm2607_vm0, %v2606_v0 }
 0x35c   :  { %2294 = vmatprep.subr.bf16.mxu0 %v2606_v0  ;;  %v681_v33 = vcombine.low %v2859_v30, %v2862_v31  ;;  %v682_v34 = vcombine.high %v2859_v30, %v2862_v31 }
 0x3e5   :  { %v2871_v35 = vpop.f32.mrf.mxu1 }
 0x3e7   :  { %v2270_v37 = vpop.f32.mrf.mxu1 }
 0x3e9   :  { %v630_v38 = vpop.f32.mrf.mxu1 }
 0x3eb   :  { %v2271_v39 = vpop.f32.mrf.mxu1 }
 0x3ed   :  { %v815_v40 = vpop.f32.mrf.mxu1 }
 0x3ee   :  { %v816_v41 = vadd.f32 %v815_v40, %v2794_v32 }
 0x3ef   :  { %v2276_v42 = vpop.f32.mrf.mxu1 }
 0x3f0   :  { %v897_v43 = vsel %vm363_vm2, %v816_v41, -inf  ;;  %v1019_v42 = vld [vmem:[#allocation13 + $0x4] sm:$0xf] }
 0x3f1   :  { %898 = vmax.xlane.f32.xlu1 %v897_v43  ;;  %v893_v44 = vpop.f32.mrf.mxu1  ;;  %v1024_v43 = vsel %vm543_vm5, %v1019_v42, 0 }
 0x3f2   :  { %v894_v45 = vadd.f32 %v893_v44, %v2798_v36 }
 0x3f3   :  { %v2281_v46 = vpop.f32.mrf.mxu1 }
 0x3f4   :  { %v900_v47 = vsel %vm363_vm2, %v894_v45, -inf }
 0x3f5   :  { %901 = vmax.xlane.f32.xlu1 %v900_v47 }
 0x41a   :  { %v581_v48 = vpop.f32.mrf.mxu0 }
 0x41b   :  { %v633_v49 = vpack.c.bf16 %v2871_v35, %v581_v48 }
 0x41c   :  { %v2264_v50 = vpop.f32.mrf.mxu0 }
 0x41e   :  { %v584_v51 = vpop.f32.mrf.mxu0 }
 0x420   :  { %v2265_v52 = vpop.f32.mrf.mxu0 }
 0x47a   :  { %v899_v53 = vpop.xlane.xlu1 %898 }
 0x47b   :  { %v903_v54 = vsub.f32 %v816_v41, %v899_v53  ;;  %v1294_v41 = vpop.permute.xlu0 %1293 }
 0x47d   :  { %v905_v55 = vmul.f32 1.442695, %v903_v54 }
 0x47e   :  { %v902_v58 = vpop.xlane.xlu1 %901 }
 0x47f   :  { %2401 = vpow2.f32 %v905_v55  ;;  %v904_v59 = vsub.f32 %v894_v45, %v902_v58  ;;  %v1216_v55 = vpop.permute.xlu0 %1215 }
 0x481   :  { %v907_v60 = vmul.f32 1.442695, %v904_v59 }
 0x483   :  { %2403 = vpow2.f32 %v907_v60 }
 0x48c   :  { %v2402_v61 = vpop.eup %2401 }
 0x48d   :  { %v909_v62 = vsel %vm363_vm2, %v2402_v61, 0.0 }
 0x48e   :  { %910 = vadd.xlane.f32.xlu1 %v909_v62 }
 0x490   :  { %v2404_v63 = vpop.eup %2403 }
 0x491   :  { %v912_v1 = vsel %vm363_vm2, %v2404_v63, 0.0 }
 0x492   :  { %913 = vadd.xlane.f32.xlu1 %v912_v1 }
 0x4a3   :  { %969 = vrot.lane.b32.xlu1 %v2809_v57, %s2608_s16 }
 0x4a7   :  { %1295 = vrot.lane.b32.xlu1 %v2769_v20, %s2609_s9 }
 0x4ab   :  { %1217 = vrot.lane.b32.xlu1 %v2760_v14, %s2609_s9 }
 0x517   :  { %v911_v2 = vpop.xlane.xlu1 %910 }
 0x518   :  { %2405 = vrcp.f32 %v911_v2 }
 0x51b   :  { %v914_v3 = vpop.xlane.xlu1 %913 }
 0x51c   :  { %2407 = vrcp.f32 %v914_v3 }
 0x51f   :  { %v970_v4 = vpop.permute.xlu1 %969 }
 0x520   :  { %v975_v5 = vsel %vm543_vm5, %v970_v4, 0 }
 0x521   :  { %2289 = vmatpush3.bf16.msra.mxu1 %v975_v5 }
 0x522   :  { %2300 = vmatprep.subr.bf16.mxu1 %v2606_v0 }
 0x523   :  { %v1296_v40 = vpop.permute.xlu1 %1295 }
 0x525   :  { %v2406_v6 = vpop.eup %2405 }
 0x526   :  { %v917_v7 = vmul.f32 %v2406_v6, %v2402_v61 }
 0x527   :  { %v1218_v51 = vpop.permute.xlu1 %1217 }
 0x528   :  { %v919_v8 = vpack.c.bf16 %v917_v7, %v917_v7  ;;  %v1114_v12 = vcombine.high %v917_v7, %v2606_v0  ;;  %v2894_v19 = vrot.slane %v917_v7, %v2842_v15 }
 0x529   :  { %v2408_v10 = vpop.eup %2407 }
 0x52a   :  { %v918_v11 = vmul.f32 %v2408_v10, %v2404_v63  ;;  %2285 = vmatmul.mubr.msk.bf16.vlgmr.msra.gmra.mxu0 %vm363_vm2, %v919_v8  ;;  %v2906_v35 = vrot.slane %v1114_v12, %v2842_v15  ;;  %v2612_v12 = vmov 1934713408  }
 0x52b   :  { %2296 = vmatprep.mubr.msk.bf16.mxu0 %vm2607_vm0, %v2606_v0  ;;  %2295 = vmatpush3.bf16.msra.mxu0 %v1024_v43 }
 0x52c   :  { %v920_v18 = vpack.c.bf16 %v918_v11, %v918_v11  ;;  %v2897_v21 = vrot.slane %v918_v11, %v2842_v15  ;;  %v1129_v23 = vcombine.high %v918_v11, %v2606_v0  ;;  %2306 = vmatprep.subr.mxu0 %v2606_v0 }
 0x52e   :  { %2291 = vmatmul.mubr.msk.bf16.vlgmr.msra.gmra.mxu1 %vm363_vm2, %v920_v18  ;;  %v1144_v25 = vcombine.low %v2894_v19, %v2897_v21  ;;  %v1145_v27 = vcombine.high %v2894_v19, %v2897_v21  ;;  %v2909_v37 = vrot.slane %v1129_v23, %v2842_v15 }
 0x52f   :  { %2301 = vmatpush3.bf16.msra.mxu1 %v1071_v17  ;;  %2302 = vmatprep.mubr.msk.bf16.mxu1 %vm2607_vm0, %v2606_v0  ;;  %v668_v17 = vunpack.c.l.s4 %v2612_v12 }
 0x530   :  { %2311 = vmatprep.subr.mxu1 %v2606_v0  ;;  %v1160_v38 = vcombine.low %v2906_v35, %v2909_v37  ;;  %v1161_v39 = vcombine.high %v2906_v35, %v2909_v37 }
 0x531   :  { %v669_v18 = vunpack.c.0.s8 %v668_v17 }
 0x533   :  { %v2962_v23 = vsub.s32 %v669_v18, %v2839_v13 }
 0x535   :  { %v2979_v13 = vrot.slane %v1145_v27, %v2962_v23  ;;  %v689_v22 = vrot.slane %v681_v33, %v2962_v23 }
 0x536   :  { %2303 = vmatmul.mubr.msk.bf16.vlgmr.msra.gmra.mxu1 %vm363_vm2, %v633_v49 }
 0x537   :  { %2312 = vmatpush3.xpose.msk.msra.mxu1 %vm363_vm2, %v1296_v40  ;;  %2313 = vmatprep.mubr.msk.f32.mxu1 %vm2607_vm0, %v2606_v0  ;;  %v699_v26 = vcombine.high %v689_v22, %v2606_v0 }
 0x538   :  { %2322 = vmatprep.subr.bf16.mxu1 %v2606_v0 }
 0x53e   :  { %2314 = vmatmul.mubr.msk.f32.vlgmr.msra.gmra.mxu1 %vm363_vm2, %v1294_v41 }
 0x53f   :  { %2324 = vmatprep.mubr.msk.bf16.mxu1 %vm2607_vm0, %v2606_v0 }
 0x5ea   :  { %v963_v44 = vpop.f32.mrf.mxu0 }
 0x5ec   :  { %v2286_v45 = vpop.f32.mrf.mxu0 }
 0x5ee   :  { %v966_v46 = vpop.f32.mrf.mxu0  ;;  %v1011_v47 = vpop.f32.mrf.mxu1 }
 0x5ef   :  { %v1017_v48 = vpack.c.bf16 %v1011_v47, %v963_v44 }
 0x5f0   :  { %v2287_v49 = vpop.f32.mrf.mxu0  ;;  %v2292_v50 = vpop.f32.mrf.mxu1 }
 0x5f1   :  { %2297 = vmatmul.mubr.msk.bf16.vlgmr.msra.gmra.mxu0 %vm363_vm2, %v1017_v48 }
 0x5f2   :  { %2307 = vmatpush3.xpose.msk.msra.mxu0 %vm363_vm2, %v1218_v51  ;;  %v1014_v52 = vpop.f32.mrf.mxu1  ;;  %2308 = vmatprep.mubr.msk.f32.mxu0 %vm2607_vm0, %v2606_v0 }
 0x5f3   :  { %2316 = vmatprep.subr.bf16.mxu0 %v2606_v0 }
 0x5f4   :  { %v2293_v53 = vpop.f32.mrf.mxu1 }
 0x5f6   :  { %v2933_v54 = vpop.f32.mrf.mxu1 }
 0x5f8   :  { %v2304_v58 = vpop.f32.mrf.mxu1 }
 0x5f9   :  { %2309 = vmatmul.mubr.msk.f32.vlgmr.msra.gmra.mxu0 %vm363_vm2, %v1216_v55 }
 0x5fa   :  { %v2936_v59 = vpop.f32.mrf.mxu1  ;;  %2318 = vmatprep.mubr.msk.bf16.mxu0 %vm2607_vm0, %v2606_v0 }
 0x5fc   :  { %v2305_v60 = vpop.f32.mrf.mxu1 }
 0x5fe   :  { %v1367_v61 = vpop.f32.mrf.mxu1 }
 0x5ff   :  { %v1368_v62 = vadd.f32 %v1367_v61, %v2798_v36 }
 0x600   :  { %v2315_v63 = vpop.f32.mrf.mxu1 }
 0x601   :  { %v1374_v1 = vsel %vm363_vm2, %v1368_v62, -inf }
 0x602   :  { %1375 = vmax.xlane.f32.xlu1 %v1374_v1 }
 0x613   :  { %1646 = vrot.lane.b32.xlu1 %v2760_v14, %s2611_s17 }
 0x617   :  { %1644 = vrot.lane.b32.xlu1 %v2762_v16, %s2611_s17 }
 0x61b   :  { %1722 = vrot.lane.b32.xlu1 %v2777_v24, %s2611_s17 }
 0x68b   :  { %v1376_v2 = vpop.xlane.xlu1 %1375 }
 0x68c   :  { %v1378_v3 = vsub.f32 %v1368_v62, %v1376_v2 }
 0x68e   :  { %v1381_v4 = vmul.f32 1.442695, %v1378_v3 }
 0x68f   :  { %v1647_v45 = vpop.permute.xlu1 %1646 }
 0x690   :  { %2409 = vpow2.f32 %v1381_v4 }
 0x693   :  { %v1645_v19 = vpop.permute.xlu1 %1644 }
 0x697   :  { %v1723_v27 = vpop.permute.xlu1 %1722 }
 0x69d   :  { %v2410_v5 = vpop.eup %2409 }
 0x69e   :  { %v1386_v6 = vsel %vm363_vm2, %v2410_v5, 0.0 }
 0x69f   :  { %1387 = vadd.xlane.f32.xlu0 %v1386_v6 }
 0x6b1   :  { %v2949_v7 = vpop.f32.mrf.mxu0 }
 0x6b3   :  { %v2298_v8 = vpop.f32.mrf.mxu0 }
 0x6b5   :  { %1443 = vrot.lane.b32.xlu0 %v2809_v57, %s2609_s9  ;;  %v2953_v14 = vpop.f32.mrf.mxu0 }
 0x6b7   :  { %v2299_v16 = vpop.f32.mrf.mxu0 }
 0x6b9   :  { %1724 = vrot.lane.b32.xlu0 %v2769_v20, %s2611_s17  ;;  %v1289_v24 = vpop.f32.mrf.mxu0  ;;  %v2968_v20 = vrot.slane %v1144_v25, %v2962_v23 }
 0x6ba   :  { %v1290_v10 = vadd.f32 %v1289_v24, %v2794_v32 }
 0x6bb   :  { %v2310_v9 = vpop.f32.mrf.mxu0  ;;  %v1176_v40 = vcombine.high %v2968_v20, %v2606_v0 }
 0x6bc   :  { %v1371_v11 = vsel %vm363_vm2, %v1290_v10, -inf }
 0x6d8   :  { %1372 = vmax.xlane.f32.xlu0 %v1371_v11 }
 0x6ee   :  { %1395 = vrot.lane.b32.xlu0 %v2807_v56, %s2609_s9 }
 0x6f2   :  { %1824 = vrot.lane.b32.xlu0 %v2807_v56, %s2611_s17 }
 0x6f6   :  { %1181 = vrot.lane.b32.xlu0 %v1176_v40, %s2598_s14 }
 0x6fa   :  { %1185 = vrot.lane.b32.xlu0 %v2979_v13, %s2613_s20 }
 0x728   :  { %v1388_v25 = vpop.xlane.xlu0 %1387 }
 0x729   :  { %2411 = vrcp.f32 %v1388_v25 }
 0x72c   :  { %v1444_v41 = vpop.permute.xlu0 %1443 }
 0x72d   :  { %v1449_v56 = vsel %vm543_vm5, %v1444_v41, 0  ;;  %v1493_v41 = vld [vmem:[#allocation13 + $0x8] sm:$0xf] }
 0x72e   :  { %2323 = vmatpush3.bf16.msra.mxu1 %v1449_v56  ;;  %v1498_v56 = vsel %vm543_vm5, %v1493_v41, 0 }
 0x72f   :  { %2334 = vmatprep.subr.mxu1 %v2606_v0 }
 0x730   :  { %v1725_v21 = vpop.permute.xlu0 %1724 }
 0x736   :  { %v2412_v42 = vpop.eup %2411 }
 0x737   :  { %v1392_v43 = vmul.f32 %v2412_v42, %v2410_v5 }
 0x739   :  { %v1394_v44 = vpack.c.bf16 %v1392_v43, %v1392_v43  ;;  %v1558_v24 = vcombine.high %v1392_v43, %v2606_v0 }
 0x73b   :  { %2325 = vmatmul.mubr.msk.bf16.vlgmr.msra.gmra.mxu1 %vm363_vm2, %v1394_v44  ;;  %v3024_v18 = vrot.slane %v1558_v24, %v2842_v15 }
 0x73c   :  { %2335 = vmatpush3.xpose.msk.msra.mxu1 %vm363_vm2, %v1647_v45  ;;  %2336 = vmatprep.mubr.msk.f32.mxu1 %vm2607_vm0, %v2606_v0 }
 0x73d   :  { %2339 = vmatprep.subr.mxu1 %v2606_v0 }
 0x743   :  { %2337 = vmatmul.mubr.msk.f32.vlgmr.msra.gmra.mxu1 %vm363_vm2, %v1645_v19 }
 0x744   :  { %2340 = vmatpush3.xpose.msk.msra.mxu1 %vm363_vm2, %v1725_v21  ;;  %2341 = vmatprep.mubr.msk.f32.mxu1 %vm2607_vm0, %v2606_v0 }
 0x745   :  { %2350 = vmatprep.subr.bf16.mxu1 %v2606_v0 }
 0x747   :  { %2342 = vmatmul.mubr.msk.f32.vlgmr.msra.gmra.mxu1 %vm363_vm2, %v1723_v27 }
 0x748   :  { %2352 = vmatprep.mubr.msk.bf16.mxu1 %vm2607_vm0, %v2606_v0 }
 0x761   :  { %v1373_v46 = vpop.xlane.xlu0 %1372 }
 0x762   :  { %v1377_v47 = vsub.f32 %v1290_v10, %v1373_v46 }
 0x764   :  { %v1379_v48 = vmul.f32 1.442695, %v1377_v47 }
 0x765   :  { %v1396_v49 = vpop.permute.xlu0 %1395 }
 0x766   :  { %2413 = vpow2.f32 %v1379_v48  ;;  %v1401_v50 = vsel %vm543_vm5, %v1396_v49, 0  ;;  %v1177_v49 = vcombine.high %v2979_v13, %v2606_v0 }
 0x767   :  { %2317 = vmatpush3.bf16.msra.mxu0 %v1401_v50  ;;  %v1168_v50 = vrot.slane %v1160_v38, %v2962_v23  ;;  %v3058_v38 = vrot.slane %v665_v28, %v2962_v23 }
 0x768   :  { %2328 = vmatprep.subr.bf16.mxu0 %v2606_v0 }
 0x773   :  { %v2414_v51 = vpop.eup %2413 }
 0x774   :  { %v1383_v52 = vsel %vm363_vm2, %v2414_v51, 0.0 }
 0x775   :  { %1384 = vadd.xlane.f32.xlu1 %v1383_v52  ;;  %v697_v52 = vcombine.high %v3058_v38, %v2606_v0 }
 0x7fb   :  { %v3001_v53 = vpop.f32.mrf.mxu1 }
 0x7fd   :  { %v2326_v55 = vpop.f32.mrf.mxu1 }
 0x7fe   :  { %v1385_v58 = vpop.xlane.xlu1 %1384  ;;  %v1825_v55 = vpop.permute.xlu0 %1824 }
 0x7ff   :  { %2415 = vrcp.f32 %v1385_v58  ;;  %v1488_v60 = vpop.f32.mrf.mxu1  ;;  %v680_v58 = vrot.slane %v666_v29, %v2962_v23  ;;  %v1830_v28 = vsel %vm543_vm5, %v1825_v55, 0  ;;  %v696_v29 = vrot.slane %v682_v34, %v2962_v23 }
 0x801   :  { %v2327_v61 = vpop.f32.mrf.mxu1 }
 0x802   :  { %v698_v61 = vcombine.high %v680_v58, %v2606_v0 }
 0x803   :  { %v1718_v62 = vpop.f32.mrf.mxu1 }
 0x804   :  { %v1719_v63 = vadd.f32 %v1718_v62, %v2794_v32  ;;  %v3012_v32 = vrot.slane %v1392_v43, %v2842_v15  ;;  %v700_v62 = vcombine.high %v696_v29, %v2606_v0 }
 0x805   :  { %v2338_v1 = vpop.f32.mrf.mxu1 }
 0x806   :  { %v1800_v2 = vsel %vm363_vm2, %v1719_v63, -inf }
 0x807   :  { %v1796_v3 = vpop.f32.mrf.mxu1  ;;  %1801 = vmax.xlane.f32.xlu1 %v1800_v2 }
 0x808   :  { %v1797_v4 = vadd.f32 %v1796_v3, %v2798_v36 }
 0x809   :  { %v2343_v5 = vpop.f32.mrf.mxu1 }
 0x80a   :  { %v1803_v6 = vsel %vm363_vm2, %v1797_v4, -inf  ;;  %v1182_v5 = vpop.permute.xlu0 %1181 }
 0x80b   :  { %1804 = vmax.xlane.f32.xlu1 %v1803_v6 }
 0x80c   :  { %v2416_v8 = vpop.eup %2415 }
 0x80d   :  { %v1391_v16 = vmul.f32 %v2416_v8, %v2414_v51  ;;  %v1178_v51 = vcombine.high %v1168_v50, %v2606_v0 }
 0x80e   :  { %v1186_v24 = vpop.permute.xlu0 %1185 }
 0x80f   :  { %v1393_v9 = vpack.c.bf16 %v1391_v16, %v1391_v16  ;;  %v3009_v10 = vrot.slane %v1391_v16, %v2842_v15  ;;  %v1543_v11 = vcombine.high %v1391_v16, %v2606_v0 }
 0x811   :  { %2319 = vmatmul.mubr.msk.bf16.vlgmr.msra.gmra.mxu0 %vm363_vm2, %v1393_v9  ;;  %v1573_v36 = vcombine.low %v3009_v10, %v3012_v32  ;;  %v1574_v12 = vcombine.high %v3009_v10, %v3012_v32  ;;  %v3021_v17 = vrot.slane %v1543_v11, %v2842_v15 }
 0x812   :  { %2330 = vmatprep.mubr.msk.bf16.mxu0 %vm2607_vm0, %v2606_v0  ;;  %2329 = vmatpush3.bf16.msra.mxu0 %v1498_v56  ;;  %v1208_v56 = vsel %vm363_vm2, %v2968_v20, %v1182_v5 }
 0x813   :  { %v1589_v40 = vcombine.low %v3021_v17, %v3024_v18  ;;  %v1590_v25 = vcombine.high %v3021_v17, %v3024_v18  ;;  %2344 = vmatprep.subr.bf16.mxu0 %v2606_v0 }
 0x815   :  { %v1604_v10 = vrot.slane %v1590_v25, %v2962_v23 }
 0x817   :  { %v1608_v32 = vcombine.high %v1604_v10, %v2606_v0 }
 0x890   :  { %v1802_v42 = vpop.xlane.xlu1 %1801 }
 0x891   :  { %v1806_v43 = vsub.f32 %v1719_v63, %v1802_v42 }
 0x893   :  { %v1808_v44 = vmul.f32 1.442695, %v1806_v43 }
 0x894   :  { %v1805_v45 = vpop.xlane.xlu1 %1804 }
 0x895   :  { %2417 = vpow2.f32 %v1808_v44  ;;  %v1807_v19 = vsub.f32 %v1797_v4, %v1805_v45  ;;  %v1209_v44 = vsel %vm730_vm6, %v1208_v56, %v1186_v24 }
 0x897   :  { %v1810_v21 = vmul.f32 1.442695, %v1807_v19 }
 0x899   :  { %2419 = vpow2.f32 %v1810_v21 }
 0x8a2   :  { %v2418_v27 = vpop.eup %2417 }
 0x8a3   :  { %v1812_v46 = vsel %vm363_vm2, %v2418_v27, 0.0 }
 0x8a4   :  { %1813 = vadd.xlane.f32.xlu1 %v1812_v46 }
 0x8a6   :  { %v2420_v47 = vpop.eup %2419 }
 0x8a7   :  { %v1815_v48 = vsel %vm363_vm2, %v2420_v47, 0.0 }
 0x8a8   :  { %1816 = vadd.xlane.f32.xlu1 %v1815_v48 }
 0x8b9   :  { %1872 = vrot.lane.b32.xlu1 %v2809_v57, %s2611_s17  ;;  %v1175_v57 = vrot.slane %v1161_v39, %v2962_v23 }
 0x8bb   :  { %v1179_v13 = vcombine.high %v1175_v57, %v2606_v0 }
 0x8bd   :  { %1189 = vrot.lane.b32.xlu1 %v1177_v49, %s2614_s8 }
 0x8c1   :  { %1193 = vrot.lane.b32.xlu1 %v1168_v50, %s2615_s21 }
 0x8c5   :  { %1197 = vrot.lane.b32.xlu1 %v1178_v51, %s2616_s22 }
 0x8c9   :  { %1201 = vrot.lane.b32.xlu1 %v1175_v57, %s2617_s1 }
 0x8cd   :  { %1205 = vrot.lane.b32.xlu1 %v1179_v13, %s2618_s23 }
 0x8d1   :  { %702 = vrot.lane.b32.xlu1 %v697_v52, %s2598_s14  ;;  %v1437_v35 = vpop.f32.mrf.mxu0 }
 0x8d2   :  { %v1491_v37 = vpack.c.bf16 %v3001_v53, %v1437_v35 }
 0x8d3   :  { %v2320_v39 = vpop.f32.mrf.mxu0 }
 0x8d4   :  { %2331 = vmatmul.mubr.msk.bf16.vlgmr.msra.gmra.mxu0 %vm363_vm2, %v1491_v37 }
 0x8d5   :  { %2345 = vmatpush3.bf16.msra.mxu0 %v1830_v28  ;;  %706 = vrot.lane.b32.xlu1 %v680_v58, %s2613_s20  ;;  %v1440_v60 = vpop.f32.mrf.mxu0 }
 0x8d6   :  { %2346 = vmatprep.mubr.msk.bf16.mxu0 %vm2607_vm0, %v2606_v0  ;;  %2356 = vmatprep.subr.bf16.mxu0 %v2606_v0  ;;  %v3129_v60 = vrot.slane %v1573_v36, %v2962_v23  ;;  %v1597_v36 = vrot.slane %v1589_v40, %v2962_v23 }
 0x8d7   :  { %v2321_v53 = vpop.f32.mrf.mxu0 }
 0x8d8   :  { %v1605_v53 = vcombine.high %v3129_v60, %v2606_v0 }
 0x8d9   :  { %710 = vrot.lane.b32.xlu1 %v698_v61, %s2614_s8  ;;  %v1588_v61 = vrot.slane %v1574_v12, %v2962_v23  ;;  %v1922_v12 = vld [vmem:[#allocation13 + $0xc] sm:$0xf] }
 0x8da   :  { %v1927_v40 = vsel %vm543_vm5, %v1922_v12, 0 }
 0x8dd   :  { %714 = vrot.lane.b32.xlu1 %v689_v22, %s2615_s21  ;;  %v1606_v22 = vcombine.high %v1588_v61, %v2606_v0 }
 0x8e1   :  { %718 = vrot.lane.b32.xlu1 %v699_v26, %s2616_s22  ;;  %v1607_v26 = vcombine.high %v1597_v36, %v2606_v0 }
 0x8e5   :  { %722 = vrot.lane.b32.xlu1 %v696_v29, %s2617_s1  ;;  %v1108_v29 = vadd.f32 %v2933_v54, %v2949_v7 }
 0x8e9   :  { %726 = vrot.lane.b32.xlu1 %v700_v62, %s2618_s23 }
 0x92d   :  { %v1814_v63 = vpop.xlane.xlu1 %1813 }
 0x92e   :  { %2421 = vrcp.f32 %v1814_v63 }
 0x931   :  { %v1817_v33 = vpop.xlane.xlu1 %1816 }
 0x932   :  { %2423 = vrcp.f32 %v1817_v33 }
 0x935   :  { %v1873_v1 = vpop.permute.xlu1 %1872 }
 0x936   :  { %v1878_v2 = vsel %vm543_vm5, %v1873_v1, 0 }
 0x937   :  { %2351 = vmatpush3.bf16.msra.mxu1 %v1878_v2 }
 0x939   :  { %v1190_v3 = vpop.permute.xlu1 %1189 }
 0x93a   :  { %v1210_v19 = vsel %vm732_vm7, %v1209_v44, %v1190_v3 }
 0x93b   :  { %v2422_v4 = vpop.eup %2421 }
 0x93c   :  { %v1820_v6 = vmul.f32 %v2422_v4, %v2418_v27 }
 0x93d   :  { %v1194_v30 = vpop.permute.xlu1 %1193 }
 0x93e   :  { %v1822_v31 = vpack.c.bf16 %v1820_v6, %v1820_v6  ;;  %v1979_v11 = vrot.slane %v1820_v6, %v2842_v15  ;;  %v1972_v48 = vcombine.high %v1820_v6, %v2606_v0 }
 0x93f   :  { %v2424_v34 = vpop.eup %2423 }
 0x940   :  { %v1821_v8 = vmul.f32 %v2424_v34, %v2420_v47  ;;  %2347 = vmatmul.mubr.msk.bf16.vlgmr.msra.gmra.mxu0 %vm363_vm2, %v1822_v31  ;;  %v1211_v47 = vsel %vm172_vm1, %v1210_v19, %v1194_v30  ;;  %v1986_v52 = vrot.slane %v1972_v48, %v2842_v15 }
 0x941   :  { %v1198_v16 = vpop.permute.xlu1 %1197  ;;  %2358 = vmatprep.mubr.msk.bf16.mxu0 %vm2607_vm0, %v2606_v0  ;;  %2357 = vmatpush3.bf16.msra.mxu0 %v1927_v40 }
 0x942   :  { %v1823_v9 = vpack.c.bf16 %v1821_v8, %v1821_v8  ;;  %v1994_v41 = vrot.slane %v1821_v8, %v2842_v15  ;;  %v1987_v46 = vcombine.high %v1821_v8, %v2606_v0  ;;  %v1212_v20 = vsel %vm735_vm8, %v1211_v47, %v1198_v16 }
 0x944   :  { %2353 = vmatmul.mubr.msk.bf16.vlgmr.msra.gmra.mxu1 %vm363_vm2, %v1823_v9  ;;  %v2003_v42 = vcombine.high %v1979_v11, %v1994_v41  ;;  %v2002_v43 = vcombine.low %v1979_v11, %v1994_v41  ;;  %v2001_v13 = vrot.slane %v1987_v46, %v2842_v15 }
 0x945   :  { %v1202_v45 = vpop.permute.xlu1 %1201 }
 0x946   :  { %v2017_v21 = vrot.slane %v2003_v42, %v2962_v23  ;;  %v2010_v27 = vrot.slane %v2002_v43, %v2962_v23  ;;  %v1213_v49 = vsel %vm737_vm9, %v1212_v20, %v1202_v45  ;;  %v2018_v35 = vcombine.low %v1986_v52, %v2001_v13 }
 0x947   :  { %v2019_v39 = vcombine.high %v1986_v52, %v2001_v13 }
 0x948   :  { %2043 = vrot.lane.b32.xlu0 %v2017_v21, %s2613_s20  ;;  %v2034_v57 = vcombine.high %v2010_v27, %v2606_v0  ;;  %v2035_v55 = vcombine.high %v2017_v21, %v2606_v0  ;;  %v2026_v37 = vrot.slane %v2018_v35, %v2962_v23 }
 0x949   :  { %v1206_v50 = vpop.permute.xlu1 %1205  ;;  %v2033_v58 = vrot.slane %v2019_v39, %v2962_v23  ;;  %v1111_v23 = vadd.f32 %v2936_v59, %v2953_v14 }
 0x94a   :  { %v1214_v51 = vsel %vm739_vm10, %v1213_v49, %v1206_v50  ;;  %v2036_v28 = vcombine.high %v2026_v37, %v2606_v0 }
 0x94b   :  { %2085 = vrot.lane.b32.xlu1 %v1214_v51, %s2599_s18  ;;  %v2037_v15 = vcombine.high %v2033_v58, %v2606_v0 }
 0x94c   :  { %2039 = vrot.lane.b32.xlu0 %v2034_v57, %s2598_s14 }
 0x94d   :  { %v703_v44 = vpop.permute.xlu1 %702 }
 0x94e   :  { %v729_v57 = vsel %vm363_vm2, %v3058_v38, %v703_v44 }
 0x950   :  { %2047 = vrot.lane.b32.xlu0 %v2035_v55, %s2614_s8 }
 0x951   :  { %v707_v19 = vpop.permute.xlu1 %706 }
 0x952   :  { %v731_v55 = vsel %vm730_vm6, %v729_v57, %v707_v19 }
 0x954   :  { %2051 = vrot.lane.b32.xlu0 %v2026_v37, %s2615_s21 }
 0x958   :  { %2059 = vrot.lane.b32.xlu0 %v2033_v58, %s2617_s1 }
 0x95c   :  { %2055 = vrot.lane.b32.xlu0 %v2036_v28, %s2616_s22 }
 0x960   :  { %2063 = vrot.lane.b32.xlu0 %v2037_v15, %s2618_s23 }
 0x964   :  { %1610 = vrot.lane.b32.xlu0 %v1605_v53, %s2598_s14 }
 0x968   :  { %1614 = vrot.lane.b32.xlu0 %v1588_v61, %s2613_s20 }
 0x96c   :  { %1618 = vrot.lane.b32.xlu0 %v1606_v22, %s2614_s8 }
 0x970   :  { %1622 = vrot.lane.b32.xlu0 %v1597_v36, %s2615_s21 }
 0x974   :  { %1626 = vrot.lane.b32.xlu0 %v1607_v26, %s2616_s22 }
 0x978   :  { %1630 = vrot.lane.b32.xlu0 %v1604_v10, %s2617_s1 }
 0x97c   :  { %1634 = vrot.lane.b32.xlu0 %v1608_v32, %s2618_s23 }
 0x994   :  { %v1534_v62 = vpop.f32.mrf.mxu0 }
 0x995   :  { %v3159_v63 = vadd.f32 %v1534_v62, %v1108_v29  ;;  %v2173_v62 = vld [vmem:[%s3217_s11] ss:$0 sm:$0xff] }
 0x996   :  { %v2332_v33 = vpop.f32.mrf.mxu0 }
 0x998   :  { %v1537_v17 = vpop.f32.mrf.mxu0 }
 0x999   :  { %v3163_v18 = vadd.f32 %v1537_v17, %v1111_v23 }
 0x99a   :  { %v2333_v0 = vpop.f32.mrf.mxu0 }
 0x9ba   :  { %v2044_v25 = vpop.permute.xlu0 %2043 }
 0x9be   :  { %v2040_v1 = vpop.permute.xlu0 %2039 }
 0x9bf   :  { %v2066_v4 = vsel %vm363_vm2, %v2010_v27, %v2040_v1  ;;  %v711_v27 = vpop.permute.xlu1 %710 }
 0x9c0   :  { %v2067_v54 = vsel %vm730_vm6, %v2066_v4, %v2044_v25  ;;  %v733_v37 = vsel %vm732_vm7, %v731_v55, %v711_v27 }
 0x9c2   :  { %v2048_v2 = vpop.permute.xlu0 %2047 }
 0x9c3   :  { %v2068_v7 = vsel %vm732_vm7, %v2067_v54, %v2048_v2  ;;  %v715_v47 = vpop.permute.xlu1 %714 }
 0x9c4   :  { %v734_v28 = vsel %vm172_vm1, %v733_v37, %v715_v47 }
 0x9c6   :  { %v2052_v3 = vpop.permute.xlu0 %2051 }
 0x9c7   :  { %v2069_v6 = vsel %vm172_vm1, %v2068_v7, %v2052_v3  ;;  %v719_v48 = vpop.permute.xlu1 %718 }
 0x9c8   :  { %v736_v53 = vsel %vm735_vm8, %v734_v28, %v719_v48 }
 0x9ca   :  { %v2060_v5 = vpop.permute.xlu0 %2059 }
 0x9cb   :  { %v723_v50 = vpop.permute.xlu1 %722 }
 0x9ce   :  { %v2056_v30 = vpop.permute.xlu0 %2055 }
 0x9cf   :  { %v2070_v59 = vsel %vm735_vm8, %v2069_v6, %v2056_v30  ;;  %v727_v13 = vpop.permute.xlu1 %726 }
 0x9d0   :  { %v2071_v31 = vsel %vm737_vm9, %v2070_v59, %v2060_v5 }
 0x9d2   :  { %v2064_v14 = vpop.permute.xlu0 %2063 }
 0x9d3   :  { %v2072_v34 = vsel %vm739_vm10, %v2071_v31, %v2064_v14  ;;  %v2086_v38 = vpop.permute.xlu1 %2085 }
 0x9d4   :  { %2089 = vrot.lane.b32.xlu0 %v2072_v34, %s2599_s18 }
 0x9d6   :  { %v1611_v45 = vpop.permute.xlu0 %1610 }
 0x9d7   :  { %v1637_v52 = vsel %vm363_vm2, %v3129_v60, %v1611_v45  ;;  %v738_v60 = vsel %vm737_vm9, %v736_v53, %v723_v50 }
 0x9d8   :  { %v740_v36 = vsel %vm739_vm10, %v738_v60, %v727_v13 }
 0x9d9   :  { %v2093_v32 = vsel %vm2092_vm11, %v740_v36, %v2086_v38 }
 0x9da   :  { %v1615_v21 = vpop.permute.xlu0 %1614 }
 0x9db   :  { %v1638_v35 = vsel %vm730_vm6, %v1637_v52, %v1615_v21 }
 0x9de   :  { %v1619_v46 = vpop.permute.xlu0 %1618 }
 0x9df   :  { %v1639_v39 = vsel %vm732_vm7, %v1638_v35, %v1619_v46 }
 0x9e2   :  { %v1623_v20 = vpop.permute.xlu0 %1622 }
 0x9e3   :  { %v1640_v15 = vsel %vm172_vm1, %v1639_v39, %v1623_v20 }
 0x9e6   :  { %v1627_v49 = vpop.permute.xlu0 %1626 }
 0x9e7   :  { %v1641_v61 = vsel %vm735_vm8, %v1640_v15, %v1627_v49 }
 0x9ea   :  { %v1631_v51 = vpop.permute.xlu0 %1630 }
 0x9eb   :  { %v1642_v22 = vsel %vm737_vm9, %v1641_v61, %v1631_v51 }
 0x9ee   :  { %v1635_v58 = vpop.permute.xlu0 %1634 }
 0x9ef   :  { %v1643_v26 = vsel %vm739_vm10, %v1642_v22, %v1635_v58 }
 0xa00   :  { %v1866_v8 = vpop.f32.mrf.mxu0 }
 0xa02   :  { %v2348_v16 = vpop.f32.mrf.mxu0 }
 0xa04   :  { %v1869_v24 = vpop.f32.mrf.mxu0  ;;  %v1914_v9 = vpop.f32.mrf.mxu1 }
 0xa05   :  { %v1920_v11 = vpack.c.bf16 %v1914_v9, %v1866_v8 }
 0xa06   :  { %v2349_v41 = vpop.f32.mrf.mxu0  ;;  %v2354_v56 = vpop.f32.mrf.mxu1 }
 0xa07   :  { %2359 = vmatmul.mubr.msk.bf16.vlgmr.msra.gmra.mxu0 %vm363_vm2, %v1920_v11 }
 0xa08   :  { %v1917_v42 = vpop.f32.mrf.mxu1 }
 0xa0a   :  { %v2355_v43 = vpop.f32.mrf.mxu1 }
 0xa46   :  { %v2090_v10 = vpop.permute.xlu0 %2089 }
 0xa47   :  { %v2094_v12 = vsel %vm2092_vm11, %v1643_v26, %v2090_v10 }
 0xa48   :  { %v2097_v40 = vcombine.low %v2093_v32, %v2094_v12 }
 0xa4a   :  { %2174 = vst.sshfl [vmem:[%s3219_s13] sm:$0x33 pattern:$0x76325410] %v2097_v40  ;;  %s2565_s13 = scalar_lea.vmem %s2113_s3, 256 }
 0xa4b   :  { %p2566_p7 = scmp.ne.s32.totalorder %s2113_s3, %s2565_s13  ;;  %p2571_p9 = scmp.lt.s32.totalorder %s2565_s13, %s2565_s13 }
 0xa4d   :  { %p2572_p10 = por %p2571_p9, %p2570_p8 }
 0xa4f   :  { %p2573_p11 = pnand %p2572_p10, %p2566_p7 }
 0xac7   :  { %v1963_v29 = vpop.f32.mrf.mxu0 }
 0xac8   :  { %v1970_v33 = vadd.f32 %v1963_v29, %v3159_v63 }
 0xac9   :  { %v2360_v23 = vpop.f32.mrf.mxu0 }
 0xaca   :  { %v2080_v17 = vadd.f32 %v2173_v62, %v1970_v33 }
 0xacb   :  { %v1966_v0 = vpop.f32.mrf.mxu0 }
 0xacc   :  { %2082 = vst.msk [vmem:[#allocation14] sm:$0xff] %vm172_vm1, %v2080_v17  ;;  %v1971_v25 = vadd.f32 %v1966_v0, %v3163_v18 }
 0xacd   :  { %v2361_v1 = vpop.f32.mrf.mxu0 }
 0xace   :  { %v2081_v2 = vadd.f32 %v2173_v62, %v1971_v25 }
 0xad0   :  { %2083 = vst.msk [vmem:[#allocation14 + $0x8] sm:$0xff] %vm172_vm1, %v2081_v2 }
 0xad1   :  { %2576 = shalt.err (!%p2573_p11)
}
 0xad2   :  { %2118 = dma.vmem_to_hbm [thread:$0]  %s2113_s3, 256, %s3218_s12, [#allocation4], %s2597_s30, %s2597_s30, %s2598_s14  }
 0xad3   :  { %2593 = dma.done.wait [#allocation4], 256  }
 0xad4   :  { %2594 = vsyncadd [#allocation4], 4294967040 }
 0xad5   :  { %2126 = vsyncpa [#allocation3], 1 }
 0xad6   :  { %2127 = vsyncpa [#allocation6], 1 }
 0xad7   :  { %2128 = vsyncpa [#allocation9], 1 }
 0xad8   :  { %2129 = vsyncpa [#allocation12], 1 }
 0xad9   :  { %2130 = vsyncpa [#allocation4], 1 }

</bundles_post_ra>
